<compile_context>
chip_gen: v5e
topology: v5e:2x2
jax: 0.10.0
libtpu: 0.0.40
codegen_flags: <defaults>
</compile_context>

<pallas_src>
import numpy as np
import jax
import jax.numpy as jnp
from jax import lax
from jax.experimental import pallas as pl
from jax.experimental.pallas import tpu as pltpu


# --------------------------------------------------------------------------
# Kernel
# --------------------------------------------------------------------------
def _make_cnn_kernel(n_conv):
    """Builds a kernel for `n_conv` conv(+folded-BN)+ReLU layers + 3-layer MLP."""

    def kernel(*refs):
        x_ref = refs[0]
        conv_refs = refs[1:1 + 2 * n_conv]
        (wfc1_ref, bfc1_ref,
         wfc2_ref, bfc2_ref,
         wfc3_ref, bfc3_ref) = refs[1 + 2 * n_conv:1 + 2 * n_conv + 6]
        out_ref = refs[-1]

        bb, T, _ = x_ref.shape
        x = x_ref[...].astype(jnp.float32)                       # (bb, T, Cin)

        # ---------------- conv stack: conv('same') + bias + ReLU --------------
        for li in range(n_conv):
            w_ref = conv_refs[2 * li]                            # (k, Cin, Cout)
            b_ref = conv_refs[2 * li + 1]                        # (1, Cout)
            k, cin, cout = w_ref.shape
            pad = k // 2
            zpad = jnp.zeros((bb, pad, cin), jnp.float32)
            xp = jnp.concatenate([zpad, x, zpad], axis=1)        # (bb, T+2p, Cin)
            acc = jnp.zeros((bb * T, cout), jnp.float32)
            for d in range(k):                                   # static unroll
                xs = xp[:, d:d + T, :].reshape(bb * T, cin)
                acc = acc + jnp.dot(xs, w_ref[d],
                                    preferred_element_type=jnp.float32)
            x = jnp.maximum(acc + b_ref[...], 0.0).reshape(bb, T, cout)

        # ---------------- MLP head (dropouts are identity in eval) ------------
        h = x.reshape(bb * T, x.shape[-1])
        h = jnp.maximum(jnp.dot(h, wfc1_ref[...],
                                preferred_element_type=jnp.float32)
                        + bfc1_ref[...], 0.0)
        h = jnp.maximum(jnp.dot(h, wfc2_ref[...],
                                preferred_element_type=jnp.float32)
                        + bfc2_ref[...], 0.0)
        y = jnp.dot(h, wfc3_ref[...],
                    preferred_element_type=jnp.float32) + bfc3_ref[...]
        out_ref[...] = y.reshape(bb, T, out_ref.shape[-1])

    return kernel


# --------------------------------------------------------------------------
# Wrapper
# --------------------------------------------------------------------------
def _fold_conv_bn(conv_w, conv_b, gamma, beta, mean, var, eps=1e-5):
    """Fold eval-mode BatchNorm1d into the preceding Conv1d.

    conv_w: (Cout, Cin, k) PyTorch layout.
    Returns w' with kernel-friendly layout (k, Cin, Cout) and bias (1, Cout).
    """
    scale = gamma / jnp.sqrt(var + eps)                          # (Cout,)
    w = conv_w * scale[:, None, None]
    b = (conv_b - mean) * scale + beta
    return jnp.transpose(w, (2, 1, 0)), b.reshape(1, -1)


def cnn_encoder_forward(embed_feat, params, *, block_b=2):
    """embed_feat: (B, T, in_feat_size) float32 -> (B, T, num_tags)."""
    B, T, Cin = embed_feat.shape
    conv_layers = params["conv"]
    n_conv = len(conv_layers)

    flat_inputs = [embed_feat.astype(jnp.float32)]
    for lyr in conv_layers:
        w, b = _fold_conv_bn(lyr["w"], lyr["b"], lyr["gamma"], lyr["beta"],
                             lyr["mean"], lyr["var"])
        flat_inputs += [w, b]
    flat_inputs += [params["fc1_w"].T, params["fc1_b"].reshape(1, -1),
                    params["fc2_w"].T, params["fc2_b"].reshape(1, -1),
                    params["fc3_w"].T, params["fc3_b"].reshape(1, -1)]

    num_tags = params["fc3_w"].shape[0]
    bb = min(block_b, B)
    assert B % bb == 0, "batch must be divisible by the batch tile"
    grid = (B // bb,)

    def resident(arr):                       # weight stays in VMEM (block 0 always)
        nd = arr.ndim
        return pl.BlockSpec(arr.shape, lambda i, _n=nd: (0,) * _n)

    in_specs = [pl.BlockSpec((bb, T, Cin), lambda i: (i, 0, 0))]
    in_specs += [resident(a) for a in flat_inputs[1:]]
    out_spec = pl.BlockSpec((bb, T, num_tags), lambda i: (i, 0, 0))

    return pl.pallas_call(
        _make_cnn_kernel(n_conv),
        out_shape=jax.ShapeDtypeStruct((B, T, num_tags), jnp.float32),
        grid=grid,
        in_specs=in_specs,
        out_specs=out_spec,
        compiler_params=pltpu.CompilerParams(
            dimension_semantics=("parallel",)),
    )(*flat_inputs)


# --------------------------------------------------------------------------
# Parameter init (mirrors PyTorch Conv1d / Linear defaults; non-trivial BN
# statistics so the BN folding is actually exercised)
# --------------------------------------------------------------------------
def init_params(key, in_feat_size, conv_size, fc_size, num_tags):
    keys = iter(jax.random.split(key, 64))

    def uni(shape, bound):
        return jax.random.uniform(next(keys), shape, jnp.float32, -bound, bound)

    conv_specs = [(in_feat_size, conv_size, 3),
                  (conv_size, conv_size, 3),
                  (conv_size, conv_size, 3),
                  (conv_size, conv_size, 3),
                  (conv_size, conv_size, 5),
                  (conv_size, conv_size, 5)]
    conv = []
    for cin, cout, k in conv_specs:
        bound = 1.0 / np.sqrt(cin * k)
        conv.append({
            "w": uni((cout, cin, k), bound),
            "b": uni((cout,), bound),
            "gamma": jax.random.uniform(next(keys), (cout,), jnp.float32, 0.5, 1.5),
            "beta": jax.random.uniform(next(keys), (cout,), jnp.float32, -0.1, 0.1),
            "mean": jax.random.uniform(next(keys), (cout,), jnp.float32, -0.1, 0.1),
            "var": jax.random.uniform(next(keys), (cout,), jnp.float32, 0.5, 1.5),
        })

    def linear(cin, cout):
        bound = 1.0 / np.sqrt(cin)
        return uni((cout, cin), bound), uni((cout,), bound)

    fc1_w, fc1_b = linear(conv_size, fc_size)
    fc2_w, fc2_b = linear(fc_size, fc_size)
    fc3_w, fc3_b = linear(fc_size, num_tags)
    return {"conv": conv,
            "fc1_w": fc1_w, "fc1_b": fc1_b,
            "fc2_w": fc2_w, "fc2_b": fc2_b,
            "fc3_w": fc3_w, "fc3_b": fc3_b}


# --------------------------------------------------------------------------
# Pure-JAX reference (unfolded conv / BN), for correctness checking
# --------------------------------------------------------------------------
def reference_forward(embed_feat, params, eps=1e-5):
    hp = lax.Precision.HIGHEST
    x = jnp.transpose(embed_feat, (0, 2, 1))                     # (B, Cin, T)
    for lyr in params["conv"]:
        x = lax.conv_general_dilated(
            x, lyr["w"], window_strides=(1,), padding="SAME",
            dimension_numbers=("NCH", "OIH", "NCH"), precision=hp)
        x = x + lyr["b"][None, :, None]
        x = (x - lyr["mean"][None, :, None]) / jnp.sqrt(
            lyr["var"][None, :, None] + eps)
        x = x * lyr["gamma"][None, :, None] + lyr["beta"][None, :, None]
        x = jnp.maximum(x, 0.0)
    x = jnp.transpose(x, (0, 2, 1))                              # (B, T, conv)
    h = jnp.maximum(jnp.dot(x, params["fc1_w"].T, precision=hp)
                    + params["fc1_b"], 0.0)
    h = jnp.maximum(jnp.dot(h, params["fc2_w"].T, precision=hp)
                    + params["fc2_b"], 0.0)
    return jnp.dot(h, params["fc3_w"].T, precision=hp) + params["fc3_b"]


if __name__ == "__main__":
    B, T, IN_FEAT, CONV, FC, NUM_TAGS = 4, 16, 8, 32, 64, 8

    key = jax.random.PRNGKey(0)
    k_x, k_p = jax.random.split(key)
    embed_feat = jax.random.normal(k_x, (B, T, IN_FEAT), jnp.float32)
    params = init_params(k_p, IN_FEAT, CONV, FC, NUM_TAGS)

    out = cnn_encoder_forward(embed_feat, params, block_b=2)
    out = jax.block_until_ready(out)

    ref = reference_forward(embed_feat, params)
    np.testing.assert_allclose(np.asarray(out), np.asarray(ref),
                               rtol=1e-3, atol=1e-3)

    assert out.shape == (B, T, NUM_TAGS)
    print("KERNEL_OK")
</pallas_src>

<mosaic_0001>
module attributes {stable_mosaic.version = 11 : i64} {
  func.func @kernel(%arg0: i32, %arg1: memref<2x16x8xf32, #tpu.memory_space<vmem>>, %arg2: memref<3x8x32xf32, #tpu.memory_space<vmem>>, %arg3: memref<1x32xf32, #tpu.memory_space<vmem>>, %arg4: memref<3x32x32xf32, #tpu.memory_space<vmem>>, %arg5: memref<1x32xf32, #tpu.memory_space<vmem>>, %arg6: memref<3x32x32xf32, #tpu.memory_space<vmem>>, %arg7: memref<1x32xf32, #tpu.memory_space<vmem>>, %arg8: memref<3x32x32xf32, #tpu.memory_space<vmem>>, %arg9: memref<1x32xf32, #tpu.memory_space<vmem>>, %arg10: memref<5x32x32xf32, #tpu.memory_space<vmem>>, %arg11: memref<1x32xf32, #tpu.memory_space<vmem>>, %arg12: memref<5x32x32xf32, #tpu.memory_space<vmem>>, %arg13: memref<1x32xf32, #tpu.memory_space<vmem>>, %arg14: memref<32x64xf32, #tpu.memory_space<vmem>>, %arg15: memref<1x64xf32, #tpu.memory_space<vmem>>, %arg16: memref<64x64xf32, #tpu.memory_space<vmem>>, %arg17: memref<1x64xf32, #tpu.memory_space<vmem>>, %arg18: memref<64x8xf32, #tpu.memory_space<vmem>>, %arg19: memref<1x8xf32, #tpu.memory_space<vmem>>, %arg20: memref<2x16x8xf32, #tpu.memory_space<vmem>>) attributes {dimension_semantics = [#tpu.dimension_semantics<parallel>], iteration_bounds = array<i64: 2>, scalar_prefetch = 0 : i64, scratch_operands = 0 : i64, tpu.core_type = #tpu.core_type<tc>, window_params = [{transform_indices = @transform_0, window_bounds = array<i64: 2, 16, 8>}, {pipeline_mode = #tpu.pipeline_mode<synchronous>, transform_indices = @transform_1, window_bounds = array<i64: 3, 8, 32>}, {pipeline_mode = #tpu.pipeline_mode<synchronous>, transform_indices = @transform_2, window_bounds = array<i64: 1, 32>}, {pipeline_mode = #tpu.pipeline_mode<synchronous>, transform_indices = @transform_3, window_bounds = array<i64: 3, 32, 32>}, {pipeline_mode = #tpu.pipeline_mode<synchronous>, transform_indices = @transform_4, window_bounds = array<i64: 1, 32>}, {pipeline_mode = #tpu.pipeline_mode<synchronous>, transform_indices = @transform_5, window_bounds = array<i64: 3, 32, 32>}, {pipeline_mode = #tpu.pipeline_mode<synchronous>, transform_indices = @transform_6, window_bounds = array<i64: 1, 32>}, {pipeline_mode = #tpu.pipeline_mode<synchronous>, transform_indices = @transform_7, window_bounds = array<i64: 3, 32, 32>}, {pipeline_mode = #tpu.pipeline_mode<synchronous>, transform_indices = @transform_8, window_bounds = array<i64: 1, 32>}, {pipeline_mode = #tpu.pipeline_mode<synchronous>, transform_indices = @transform_9, window_bounds = array<i64: 5, 32, 32>}, {pipeline_mode = #tpu.pipeline_mode<synchronous>, transform_indices = @transform_10, window_bounds = array<i64: 1, 32>}, {pipeline_mode = #tpu.pipeline_mode<synchronous>, transform_indices = @transform_11, window_bounds = array<i64: 5, 32, 32>}, {pipeline_mode = #tpu.pipeline_mode<synchronous>, transform_indices = @transform_12, window_bounds = array<i64: 1, 32>}, {pipeline_mode = #tpu.pipeline_mode<synchronous>, transform_indices = @transform_13, window_bounds = array<i64: 32, 64>}, {pipeline_mode = #tpu.pipeline_mode<synchronous>, transform_indices = @transform_14, window_bounds = array<i64: 1, 64>}, {pipeline_mode = #tpu.pipeline_mode<synchronous>, transform_indices = @transform_15, window_bounds = array<i64: 64, 64>}, {pipeline_mode = #tpu.pipeline_mode<synchronous>, transform_indices = @transform_16, window_bounds = array<i64: 1, 64>}, {pipeline_mode = #tpu.pipeline_mode<synchronous>, transform_indices = @transform_17, window_bounds = array<i64: 64, 8>}, {pipeline_mode = #tpu.pipeline_mode<synchronous>, transform_indices = @transform_18, window_bounds = array<i64: 1, 8>}, {transform_indices = @transform_19, window_bounds = array<i64: 2, 16, 8>}]} {
    %c0 = arith.constant 0 : index
    %c0_0 = arith.constant 0 : index
    %c0_1 = arith.constant 0 : index
    %0 = vector.load %arg1[%c0, %c0_0, %c0_1] : memref<2x16x8xf32, #tpu.memory_space<vmem>>, vector<2x16x8xf32>
    %cst = arith.constant 0.000000e+00 : f32
    %1 = vector.broadcast %cst : f32 to vector<2x1x8xf32>
    %2 = tpu.concatenate %1, %0, %1 in 1 : vector<2x1x8xf32>, vector<2x16x8xf32>, vector<2x1x8xf32> -> vector<2x18x8xf32>
    %cst_2 = arith.constant 0.000000e+00 : f32
    %3 = vector.broadcast %cst_2 : f32 to vector<32x32xf32>
    %4 = vector.extract_strided_slice %2 {offsets = [0, 0, 0], sizes = [2, 16, 8], strides = [1, 1, 1]} : vector<2x18x8xf32> to vector<2x16x8xf32>
    %5 = vector.shape_cast %4 : vector<2x16x8xf32> to vector<32x8xf32>
    %c0_3 = arith.constant 0 : index
    %c0_4 = arith.constant 0 : index
    %c0_5 = arith.constant 0 : index
    %6 = vector.load %arg2[%c0_3, %c0_4, %c0_5] : memref<3x8x32xf32, #tpu.memory_space<vmem>>, vector<1x8x32xf32>
    %7 = vector.shape_cast %6 : vector<1x8x32xf32> to vector<8x32xf32>
    %cst_6 = arith.constant dense<0.000000e+00> : vector<32x32xf32>
    %8 = tpu.matmul %5, %7, %cst_6 {dimension_numbers = #tpu.dot_dimension_numbers<[1], [0], [0], [1], [0, 0, 1, 1], [], []>} : vector<32x8xf32>, vector<8x32xf32>, vector<32x32xf32> -> vector<32x32xf32>
    %9 = arith.addf %3, %8 : vector<32x32xf32>
    %10 = vector.extract_strided_slice %2 {offsets = [0, 1, 0], sizes = [2, 16, 8], strides = [1, 1, 1]} : vector<2x18x8xf32> to vector<2x16x8xf32>
    %11 = vector.shape_cast %10 : vector<2x16x8xf32> to vector<32x8xf32>
    %c1 = arith.constant 1 : index
    %c0_7 = arith.constant 0 : index
    %c0_8 = arith.constant 0 : index
    %12 = vector.load %arg2[%c1, %c0_7, %c0_8] : memref<3x8x32xf32, #tpu.memory_space<vmem>>, vector<1x8x32xf32>
    %13 = vector.shape_cast %12 : vector<1x8x32xf32> to vector<8x32xf32>
    %cst_9 = arith.constant dense<0.000000e+00> : vector<32x32xf32>
    %14 = tpu.matmul %11, %13, %cst_9 {dimension_numbers = #tpu.dot_dimension_numbers<[1], [0], [0], [1], [0, 0, 1, 1], [], []>} : vector<32x8xf32>, vector<8x32xf32>, vector<32x32xf32> -> vector<32x32xf32>
    %15 = arith.addf %9, %14 : vector<32x32xf32>
    %16 = vector.extract_strided_slice %2 {offsets = [0, 2, 0], sizes = [2, 16, 8], strides = [1, 1, 1]} : vector<2x18x8xf32> to vector<2x16x8xf32>
    %17 = vector.shape_cast %16 : vector<2x16x8xf32> to vector<32x8xf32>
    %c2 = arith.constant 2 : index
    %c0_10 = arith.constant 0 : index
    %c0_11 = arith.constant 0 : index
    %18 = vector.load %arg2[%c2, %c0_10, %c0_11] : memref<3x8x32xf32, #tpu.memory_space<vmem>>, vector<1x8x32xf32>
    %19 = vector.shape_cast %18 : vector<1x8x32xf32> to vector<8x32xf32>
    %cst_12 = arith.constant dense<0.000000e+00> : vector<32x32xf32>
    %20 = tpu.matmul %17, %19, %cst_12 {dimension_numbers = #tpu.dot_dimension_numbers<[1], [0], [0], [1], [0, 0, 1, 1], [], []>} : vector<32x8xf32>, vector<8x32xf32>, vector<32x32xf32> -> vector<32x32xf32>
    %21 = arith.addf %15, %20 : vector<32x32xf32>
    %c0_13 = arith.constant 0 : index
    %c0_14 = arith.constant 0 : index
    %22 = vector.load %arg3[%c0_13, %c0_14] : memref<1x32xf32, #tpu.memory_space<vmem>>, vector<1x32xf32>
    %23 = vector.broadcast %22 : vector<1x32xf32> to vector<32x32xf32>
    %24 = arith.addf %21, %23 : vector<32x32xf32>
    %cst_15 = arith.constant 0.000000e+00 : f32
    %25 = vector.broadcast %cst_15 : f32 to vector<32x32xf32>
    %26 = arith.maximumf %24, %25 : vector<32x32xf32>
    %27 = vector.shape_cast %26 : vector<32x32xf32> to vector<2x16x32xf32>
    %cst_16 = arith.constant 0.000000e+00 : f32
    %28 = vector.broadcast %cst_16 : f32 to vector<2x1x32xf32>
    %29 = tpu.concatenate %28, %27, %28 in 1 : vector<2x1x32xf32>, vector<2x16x32xf32>, vector<2x1x32xf32> -> vector<2x18x32xf32>
    %cst_17 = arith.constant 0.000000e+00 : f32
    %30 = vector.broadcast %cst_17 : f32 to vector<32x32xf32>
    %31 = vector.extract_strided_slice %29 {offsets = [0, 0, 0], sizes = [2, 16, 32], strides = [1, 1, 1]} : vector<2x18x32xf32> to vector<2x16x32xf32>
    %32 = vector.shape_cast %31 : vector<2x16x32xf32> to vector<32x32xf32>
    %c0_18 = arith.constant 0 : index
    %c0_19 = arith.constant 0 : index
    %c0_20 = arith.constant 0 : index
    %33 = vector.load %arg4[%c0_18, %c0_19, %c0_20] : memref<3x32x32xf32, #tpu.memory_space<vmem>>, vector<1x32x32xf32>
    %34 = vector.shape_cast %33 : vector<1x32x32xf32> to vector<32x32xf32>
    %cst_21 = arith.constant dense<0.000000e+00> : vector<32x32xf32>
    %35 = tpu.matmul %32, %34, %cst_21 {dimension_numbers = #tpu.dot_dimension_numbers<[1], [0], [0], [1], [0, 0, 1, 1], [], []>} : vector<32x32xf32>, vector<32x32xf32>, vector<32x32xf32> -> vector<32x32xf32>
    %36 = arith.addf %30, %35 : vector<32x32xf32>
    %37 = vector.extract_strided_slice %29 {offsets = [0, 1, 0], sizes = [2, 16, 32], strides = [1, 1, 1]} : vector<2x18x32xf32> to vector<2x16x32xf32>
    %38 = vector.shape_cast %37 : vector<2x16x32xf32> to vector<32x32xf32>
    %c1_22 = arith.constant 1 : index
    %c0_23 = arith.constant 0 : index
    %c0_24 = arith.constant 0 : index
    %39 = vector.load %arg4[%c1_22, %c0_23, %c0_24] : memref<3x32x32xf32, #tpu.memory_space<vmem>>, vector<1x32x32xf32>
    %40 = vector.shape_cast %39 : vector<1x32x32xf32> to vector<32x32xf32>
    %cst_25 = arith.constant dense<0.000000e+00> : vector<32x32xf32>
    %41 = tpu.matmul %38, %40, %cst_25 {dimension_numbers = #tpu.dot_dimension_numbers<[1], [0], [0], [1], [0, 0, 1, 1], [], []>} : vector<32x32xf32>, vector<32x32xf32>, vector<32x32xf32> -> vector<32x32xf32>
    %42 = arith.addf %36, %41 : vector<32x32xf32>
    %43 = vector.extract_strided_slice %29 {offsets = [0, 2, 0], sizes = [2, 16, 32], strides = [1, 1, 1]} : vector<2x18x32xf32> to vector<2x16x32xf32>
    %44 = vector.shape_cast %43 : vector<2x16x32xf32> to vector<32x32xf32>
    %c2_26 = arith.constant 2 : index
    %c0_27 = arith.constant 0 : index
    %c0_28 = arith.constant 0 : index
    %45 = vector.load %arg4[%c2_26, %c0_27, %c0_28] : memref<3x32x32xf32, #tpu.memory_space<vmem>>, vector<1x32x32xf32>
    %46 = vector.shape_cast %45 : vector<1x32x32xf32> to vector<32x32xf32>
    %cst_29 = arith.constant dense<0.000000e+00> : vector<32x32xf32>
    %47 = tpu.matmul %44, %46, %cst_29 {dimension_numbers = #tpu.dot_dimension_numbers<[1], [0], [0], [1], [0, 0, 1, 1], [], []>} : vector<32x32xf32>, vector<32x32xf32>, vector<32x32xf32> -> vector<32x32xf32>
    %48 = arith.addf %42, %47 : vector<32x32xf32>
    %c0_30 = arith.constant 0 : index
    %c0_31 = arith.constant 0 : index
    %49 = vector.load %arg5[%c0_30, %c0_31] : memref<1x32xf32, #tpu.memory_space<vmem>>, vector<1x32xf32>
    %50 = vector.broadcast %49 : vector<1x32xf32> to vector<32x32xf32>
    %51 = arith.addf %48, %50 : vector<32x32xf32>
    %cst_32 = arith.constant 0.000000e+00 : f32
    %52 = vector.broadcast %cst_32 : f32 to vector<32x32xf32>
    %53 = arith.maximumf %51, %52 : vector<32x32xf32>
    %54 = vector.shape_cast %53 : vector<32x32xf32> to vector<2x16x32xf32>
    %cst_33 = arith.constant 0.000000e+00 : f32
    %55 = vector.broadcast %cst_33 : f32 to vector<2x1x32xf32>
    %56 = tpu.concatenate %55, %54, %55 in 1 : vector<2x1x32xf32>, vector<2x16x32xf32>, vector<2x1x32xf32> -> vector<2x18x32xf32>
    %cst_34 = arith.constant 0.000000e+00 : f32
    %57 = vector.broadcast %cst_34 : f32 to vector<32x32xf32>
    %58 = vector.extract_strided_slice %56 {offsets = [0, 0, 0], sizes = [2, 16, 32], strides = [1, 1, 1]} : vector<2x18x32xf32> to vector<2x16x32xf32>
    %59 = vector.shape_cast %58 : vector<2x16x32xf32> to vector<32x32xf32>
    %c0_35 = arith.constant 0 : index
    %c0_36 = arith.constant 0 : index
    %c0_37 = arith.constant 0 : index
    %60 = vector.load %arg6[%c0_35, %c0_36, %c0_37] : memref<3x32x32xf32, #tpu.memory_space<vmem>>, vector<1x32x32xf32>
    %61 = vector.shape_cast %60 : vector<1x32x32xf32> to vector<32x32xf32>
    %cst_38 = arith.constant dense<0.000000e+00> : vector<32x32xf32>
    %62 = tpu.matmul %59, %61, %cst_38 {dimension_numbers = #tpu.dot_dimension_numbers<[1], [0], [0], [1], [0, 0, 1, 1], [], []>} : vector<32x32xf32>, vector<32x32xf32>, vector<32x32xf32> -> vector<32x32xf32>
    %63 = arith.addf %57, %62 : vector<32x32xf32>
    %64 = vector.extract_strided_slice %56 {offsets = [0, 1, 0], sizes = [2, 16, 32], strides = [1, 1, 1]} : vector<2x18x32xf32> to vector<2x16x32xf32>
    %65 = vector.shape_cast %64 : vector<2x16x32xf32> to vector<32x32xf32>
    %c1_39 = arith.constant 1 : index
    %c0_40 = arith.constant 0 : index
    %c0_41 = arith.constant 0 : index
    %66 = vector.load %arg6[%c1_39, %c0_40, %c0_41] : memref<3x32x32xf32, #tpu.memory_space<vmem>>, vector<1x32x32xf32>
    %67 = vector.shape_cast %66 : vector<1x32x32xf32> to vector<32x32xf32>
    %cst_42 = arith.constant dense<0.000000e+00> : vector<32x32xf32>
    %68 = tpu.matmul %65, %67, %cst_42 {dimension_numbers = #tpu.dot_dimension_numbers<[1], [0], [0], [1], [0, 0, 1, 1], [], []>} : vector<32x32xf32>, vector<32x32xf32>, vector<32x32xf32> -> vector<32x32xf32>
    %69 = arith.addf %63, %68 : vector<32x32xf32>
    %70 = vector.extract_strided_slice %56 {offsets = [0, 2, 0], sizes = [2, 16, 32], strides = [1, 1, 1]} : vector<2x18x32xf32> to vector<2x16x32xf32>
    %71 = vector.shape_cast %70 : vector<2x16x32xf32> to vector<32x32xf32>
    %c2_43 = arith.constant 2 : index
    %c0_44 = arith.constant 0 : index
    %c0_45 = arith.constant 0 : index
    %72 = vector.load %arg6[%c2_43, %c0_44, %c0_45] : memref<3x32x32xf32, #tpu.memory_space<vmem>>, vector<1x32x32xf32>
    %73 = vector.shape_cast %72 : vector<1x32x32xf32> to vector<32x32xf32>
    %cst_46 = arith.constant dense<0.000000e+00> : vector<32x32xf32>
    %74 = tpu.matmul %71, %73, %cst_46 {dimension_numbers = #tpu.dot_dimension_numbers<[1], [0], [0], [1], [0, 0, 1, 1], [], []>} : vector<32x32xf32>, vector<32x32xf32>, vector<32x32xf32> -> vector<32x32xf32>
    %75 = arith.addf %69, %74 : vector<32x32xf32>
    %c0_47 = arith.constant 0 : index
    %c0_48 = arith.constant 0 : index
    %76 = vector.load %arg7[%c0_47, %c0_48] : memref<1x32xf32, #tpu.memory_space<vmem>>, vector<1x32xf32>
    %77 = vector.broadcast %76 : vector<1x32xf32> to vector<32x32xf32>
    %78 = arith.addf %75, %77 : vector<32x32xf32>
    %cst_49 = arith.constant 0.000000e+00 : f32
    %79 = vector.broadcast %cst_49 : f32 to vector<32x32xf32>
    %80 = arith.maximumf %78, %79 : vector<32x32xf32>
    %81 = vector.shape_cast %80 : vector<32x32xf32> to vector<2x16x32xf32>
    %cst_50 = arith.constant 0.000000e+00 : f32
    %82 = vector.broadcast %cst_50 : f32 to vector<2x1x32xf32>
    %83 = tpu.concatenate %82, %81, %82 in 1 : vector<2x1x32xf32>, vector<2x16x32xf32>, vector<2x1x32xf32> -> vector<2x18x32xf32>
    %cst_51 = arith.constant 0.000000e+00 : f32
    %84 = vector.broadcast %cst_51 : f32 to vector<32x32xf32>
    %85 = vector.extract_strided_slice %83 {offsets = [0, 0, 0], sizes = [2, 16, 32], strides = [1, 1, 1]} : vector<2x18x32xf32> to vector<2x16x32xf32>
    %86 = vector.shape_cast %85 : vector<2x16x32xf32> to vector<32x32xf32>
    %c0_52 = arith.constant 0 : index
    %c0_53 = arith.constant 0 : index
    %c0_54 = arith.constant 0 : index
    %87 = vector.load %arg8[%c0_52, %c0_53, %c0_54] : memref<3x32x32xf32, #tpu.memory_space<vmem>>, vector<1x32x32xf32>
    %88 = vector.shape_cast %87 : vector<1x32x32xf32> to vector<32x32xf32>
    %cst_55 = arith.constant dense<0.000000e+00> : vector<32x32xf32>
    %89 = tpu.matmul %86, %88, %cst_55 {dimension_numbers = #tpu.dot_dimension_numbers<[1], [0], [0], [1], [0, 0, 1, 1], [], []>} : vector<32x32xf32>, vector<32x32xf32>, vector<32x32xf32> -> vector<32x32xf32>
    %90 = arith.addf %84, %89 : vector<32x32xf32>
    %91 = vector.extract_strided_slice %83 {offsets = [0, 1, 0], sizes = [2, 16, 32], strides = [1, 1, 1]} : vector<2x18x32xf32> to vector<2x16x32xf32>
    %92 = vector.shape_cast %91 : vector<2x16x32xf32> to vector<32x32xf32>
    %c1_56 = arith.constant 1 : index
    %c0_57 = arith.constant 0 : index
    %c0_58 = arith.constant 0 : index
    %93 = vector.load %arg8[%c1_56, %c0_57, %c0_58] : memref<3x32x32xf32, #tpu.memory_space<vmem>>, vector<1x32x32xf32>
    %94 = vector.shape_cast %93 : vector<1x32x32xf32> to vector<32x32xf32>
    %cst_59 = arith.constant dense<0.000000e+00> : vector<32x32xf32>
    %95 = tpu.matmul %92, %94, %cst_59 {dimension_numbers = #tpu.dot_dimension_numbers<[1], [0], [0], [1], [0, 0, 1, 1], [], []>} : vector<32x32xf32>, vector<32x32xf32>, vector<32x32xf32> -> vector<32x32xf32>
    %96 = arith.addf %90, %95 : vector<32x32xf32>
    %97 = vector.extract_strided_slice %83 {offsets = [0, 2, 0], sizes = [2, 16, 32], strides = [1, 1, 1]} : vector<2x18x32xf32> to vector<2x16x32xf32>
    %98 = vector.shape_cast %97 : vector<2x16x32xf32> to vector<32x32xf32>
    %c2_60 = arith.constant 2 : index
    %c0_61 = arith.constant 0 : index
    %c0_62 = arith.constant 0 : index
    %99 = vector.load %arg8[%c2_60, %c0_61, %c0_62] : memref<3x32x32xf32, #tpu.memory_space<vmem>>, vector<1x32x32xf32>
    %100 = vector.shape_cast %99 : vector<1x32x32xf32> to vector<32x32xf32>
    %cst_63 = arith.constant dense<0.000000e+00> : vector<32x32xf32>
    %101 = tpu.matmul %98, %100, %cst_63 {dimension_numbers = #tpu.dot_dimension_numbers<[1], [0], [0], [1], [0, 0, 1, 1], [], []>} : vector<32x32xf32>, vector<32x32xf32>, vector<32x32xf32> -> vector<32x32xf32>
    %102 = arith.addf %96, %101 : vector<32x32xf32>
    %c0_64 = arith.constant 0 : index
    %c0_65 = arith.constant 0 : index
    %103 = vector.load %arg9[%c0_64, %c0_65] : memref<1x32xf32, #tpu.memory_space<vmem>>, vector<1x32xf32>
    %104 = vector.broadcast %103 : vector<1x32xf32> to vector<32x32xf32>
    %105 = arith.addf %102, %104 : vector<32x32xf32>
    %cst_66 = arith.constant 0.000000e+00 : f32
    %106 = vector.broadcast %cst_66 : f32 to vector<32x32xf32>
    %107 = arith.maximumf %105, %106 : vector<32x32xf32>
    %108 = vector.shape_cast %107 : vector<32x32xf32> to vector<2x16x32xf32>
    %cst_67 = arith.constant 0.000000e+00 : f32
    %109 = vector.broadcast %cst_67 : f32 to vector<2x2x32xf32>
    %110 = tpu.concatenate %109, %108, %109 in 1 : vector<2x2x32xf32>, vector<2x16x32xf32>, vector<2x2x32xf32> -> vector<2x20x32xf32>
    %cst_68 = arith.constant 0.000000e+00 : f32
    %111 = vector.broadcast %cst_68 : f32 to vector<32x32xf32>
    %112 = vector.extract_strided_slice %110 {offsets = [0, 0, 0], sizes = [2, 16, 32], strides = [1, 1, 1]} : vector<2x20x32xf32> to vector<2x16x32xf32>
    %113 = vector.shape_cast %112 : vector<2x16x32xf32> to vector<32x32xf32>
    %c0_69 = arith.constant 0 : index
    %c0_70 = arith.constant 0 : index
    %c0_71 = arith.constant 0 : index
    %114 = vector.load %arg10[%c0_69, %c0_70, %c0_71] : memref<5x32x32xf32, #tpu.memory_space<vmem>>, vector<1x32x32xf32>
    %115 = vector.shape_cast %114 : vector<1x32x32xf32> to vector<32x32xf32>
    %cst_72 = arith.constant dense<0.000000e+00> : vector<32x32xf32>
    %116 = tpu.matmul %113, %115, %cst_72 {dimension_numbers = #tpu.dot_dimension_numbers<[1], [0], [0], [1], [0, 0, 1, 1], [], []>} : vector<32x32xf32>, vector<32x32xf32>, vector<32x32xf32> -> vector<32x32xf32>
    %117 = arith.addf %111, %116 : vector<32x32xf32>
    %118 = vector.extract_strided_slice %110 {offsets = [0, 1, 0], sizes = [2, 16, 32], strides = [1, 1, 1]} : vector<2x20x32xf32> to vector<2x16x32xf32>
    %119 = vector.shape_cast %118 : vector<2x16x32xf32> to vector<32x32xf32>
    %c1_73 = arith.constant 1 : index
    %c0_74 = arith.constant 0 : index
    %c0_75 = arith.constant 0 : index
    %120 = vector.load %arg10[%c1_73, %c0_74, %c0_75] : memref<5x32x32xf32, #tpu.memory_space<vmem>>, vector<1x32x32xf32>
    %121 = vector.shape_cast %120 : vector<1x32x32xf32> to vector<32x32xf32>
    %cst_76 = arith.constant dense<0.000000e+00> : vector<32x32xf32>
    %122 = tpu.matmul %119, %121, %cst_76 {dimension_numbers = #tpu.dot_dimension_numbers<[1], [0], [0], [1], [0, 0, 1, 1], [], []>} : vector<32x32xf32>, vector<32x32xf32>, vector<32x32xf32> -> vector<32x32xf32>
    %123 = arith.addf %117, %122 : vector<32x32xf32>
    %124 = vector.extract_strided_slice %110 {offsets = [0, 2, 0], sizes = [2, 16, 32], strides = [1, 1, 1]} : vector<2x20x32xf32> to vector<2x16x32xf32>
    %125 = vector.shape_cast %124 : vector<2x16x32xf32> to vector<32x32xf32>
    %c2_77 = arith.constant 2 : index
    %c0_78 = arith.constant 0 : index
    %c0_79 = arith.constant 0 : index
    %126 = vector.load %arg10[%c2_77, %c0_78, %c0_79] : memref<5x32x32xf32, #tpu.memory_space<vmem>>, vector<1x32x32xf32>
    %127 = vector.shape_cast %126 : vector<1x32x32xf32> to vector<32x32xf32>
    %cst_80 = arith.constant dense<0.000000e+00> : vector<32x32xf32>
    %128 = tpu.matmul %125, %127, %cst_80 {dimension_numbers = #tpu.dot_dimension_numbers<[1], [0], [0], [1], [0, 0, 1, 1], [], []>} : vector<32x32xf32>, vector<32x32xf32>, vector<32x32xf32> -> vector<32x32xf32>
    %129 = arith.addf %123, %128 : vector<32x32xf32>
    %130 = vector.extract_strided_slice %110 {offsets = [0, 3, 0], sizes = [2, 16, 32], strides = [1, 1, 1]} : vector<2x20x32xf32> to vector<2x16x32xf32>
    %131 = vector.shape_cast %130 : vector<2x16x32xf32> to vector<32x32xf32>
    %c3 = arith.constant 3 : index
    %c0_81 = arith.constant 0 : index
    %c0_82 = arith.constant 0 : index
    %132 = vector.load %arg10[%c3, %c0_81, %c0_82] : memref<5x32x32xf32, #tpu.memory_space<vmem>>, vector<1x32x32xf32>
    %133 = vector.shape_cast %132 : vector<1x32x32xf32> to vector<32x32xf32>
    %cst_83 = arith.constant dense<0.000000e+00> : vector<32x32xf32>
    %134 = tpu.matmul %131, %133, %cst_83 {dimension_numbers = #tpu.dot_dimension_numbers<[1], [0], [0], [1], [0, 0, 1, 1], [], []>} : vector<32x32xf32>, vector<32x32xf32>, vector<32x32xf32> -> vector<32x32xf32>
    %135 = arith.addf %129, %134 : vector<32x32xf32>
    %136 = vector.extract_strided_slice %110 {offsets = [0, 4, 0], sizes = [2, 16, 32], strides = [1, 1, 1]} : vector<2x20x32xf32> to vector<2x16x32xf32>
    %137 = vector.shape_cast %136 : vector<2x16x32xf32> to vector<32x32xf32>
    %c4 = arith.constant 4 : index
    %c0_84 = arith.constant 0 : index
    %c0_85 = arith.constant 0 : index
    %138 = vector.load %arg10[%c4, %c0_84, %c0_85] : memref<5x32x32xf32, #tpu.memory_space<vmem>>, vector<1x32x32xf32>
    %139 = vector.shape_cast %138 : vector<1x32x32xf32> to vector<32x32xf32>
    %cst_86 = arith.constant dense<0.000000e+00> : vector<32x32xf32>
    %140 = tpu.matmul %137, %139, %cst_86 {dimension_numbers = #tpu.dot_dimension_numbers<[1], [0], [0], [1], [0, 0, 1, 1], [], []>} : vector<32x32xf32>, vector<32x32xf32>, vector<32x32xf32> -> vector<32x32xf32>
    %141 = arith.addf %135, %140 : vector<32x32xf32>
    %c0_87 = arith.constant 0 : index
    %c0_88 = arith.constant 0 : index
    %142 = vector.load %arg11[%c0_87, %c0_88] : memref<1x32xf32, #tpu.memory_space<vmem>>, vector<1x32xf32>
    %143 = vector.broadcast %142 : vector<1x32xf32> to vector<32x32xf32>
    %144 = arith.addf %141, %143 : vector<32x32xf32>
    %cst_89 = arith.constant 0.000000e+00 : f32
    %145 = vector.broadcast %cst_89 : f32 to vector<32x32xf32>
    %146 = arith.maximumf %144, %145 : vector<32x32xf32>
    %147 = vector.shape_cast %146 : vector<32x32xf32> to vector<2x16x32xf32>
    %cst_90 = arith.constant 0.000000e+00 : f32
    %148 = vector.broadcast %cst_90 : f32 to vector<2x2x32xf32>
    %149 = tpu.concatenate %148, %147, %148 in 1 : vector<2x2x32xf32>, vector<2x16x32xf32>, vector<2x2x32xf32> -> vector<2x20x32xf32>
    %cst_91 = arith.constant 0.000000e+00 : f32
    %150 = vector.broadcast %cst_91 : f32 to vector<32x32xf32>
    %151 = vector.extract_strided_slice %149 {offsets = [0, 0, 0], sizes = [2, 16, 32], strides = [1, 1, 1]} : vector<2x20x32xf32> to vector<2x16x32xf32>
    %152 = vector.shape_cast %151 : vector<2x16x32xf32> to vector<32x32xf32>
    %c0_92 = arith.constant 0 : index
    %c0_93 = arith.constant 0 : index
    %c0_94 = arith.constant 0 : index
    %153 = vector.load %arg12[%c0_92, %c0_93, %c0_94] : memref<5x32x32xf32, #tpu.memory_space<vmem>>, vector<1x32x32xf32>
    %154 = vector.shape_cast %153 : vector<1x32x32xf32> to vector<32x32xf32>
    %cst_95 = arith.constant dense<0.000000e+00> : vector<32x32xf32>
    %155 = tpu.matmul %152, %154, %cst_95 {dimension_numbers = #tpu.dot_dimension_numbers<[1], [0], [0], [1], [0, 0, 1, 1], [], []>} : vector<32x32xf32>, vector<32x32xf32>, vector<32x32xf32> -> vector<32x32xf32>
    %156 = arith.addf %150, %155 : vector<32x32xf32>
    %157 = vector.extract_strided_slice %149 {offsets = [0, 1, 0], sizes = [2, 16, 32], strides = [1, 1, 1]} : vector<2x20x32xf32> to vector<2x16x32xf32>
    %158 = vector.shape_cast %157 : vector<2x16x32xf32> to vector<32x32xf32>
    %c1_96 = arith.constant 1 : index
    %c0_97 = arith.constant 0 : index
    %c0_98 = arith.constant 0 : index
    %159 = vector.load %arg12[%c1_96, %c0_97, %c0_98] : memref<5x32x32xf32, #tpu.memory_space<vmem>>, vector<1x32x32xf32>
    %160 = vector.shape_cast %159 : vector<1x32x32xf32> to vector<32x32xf32>
    %cst_99 = arith.constant dense<0.000000e+00> : vector<32x32xf32>
    %161 = tpu.matmul %158, %160, %cst_99 {dimension_numbers = #tpu.dot_dimension_numbers<[1], [0], [0], [1], [0, 0, 1, 1], [], []>} : vector<32x32xf32>, vector<32x32xf32>, vector<32x32xf32> -> vector<32x32xf32>
    %162 = arith.addf %156, %161 : vector<32x32xf32>
    %163 = vector.extract_strided_slice %149 {offsets = [0, 2, 0], sizes = [2, 16, 32], strides = [1, 1, 1]} : vector<2x20x32xf32> to vector<2x16x32xf32>
    %164 = vector.shape_cast %163 : vector<2x16x32xf32> to vector<32x32xf32>
    %c2_100 = arith.constant 2 : index
    %c0_101 = arith.constant 0 : index
    %c0_102 = arith.constant 0 : index
    %165 = vector.load %arg12[%c2_100, %c0_101, %c0_102] : memref<5x32x32xf32, #tpu.memory_space<vmem>>, vector<1x32x32xf32>
    %166 = vector.shape_cast %165 : vector<1x32x32xf32> to vector<32x32xf32>
    %cst_103 = arith.constant dense<0.000000e+00> : vector<32x32xf32>
    %167 = tpu.matmul %164, %166, %cst_103 {dimension_numbers = #tpu.dot_dimension_numbers<[1], [0], [0], [1], [0, 0, 1, 1], [], []>} : vector<32x32xf32>, vector<32x32xf32>, vector<32x32xf32> -> vector<32x32xf32>
    %168 = arith.addf %162, %167 : vector<32x32xf32>
    %169 = vector.extract_strided_slice %149 {offsets = [0, 3, 0], sizes = [2, 16, 32], strides = [1, 1, 1]} : vector<2x20x32xf32> to vector<2x16x32xf32>
    %170 = vector.shape_cast %169 : vector<2x16x32xf32> to vector<32x32xf32>
    %c3_104 = arith.constant 3 : index
    %c0_105 = arith.constant 0 : index
    %c0_106 = arith.constant 0 : index
    %171 = vector.load %arg12[%c3_104, %c0_105, %c0_106] : memref<5x32x32xf32, #tpu.memory_space<vmem>>, vector<1x32x32xf32>
    %172 = vector.shape_cast %171 : vector<1x32x32xf32> to vector<32x32xf32>
    %cst_107 = arith.constant dense<0.000000e+00> : vector<32x32xf32>
    %173 = tpu.matmul %170, %172, %cst_107 {dimension_numbers = #tpu.dot_dimension_numbers<[1], [0], [0], [1], [0, 0, 1, 1], [], []>} : vector<32x32xf32>, vector<32x32xf32>, vector<32x32xf32> -> vector<32x32xf32>
    %174 = arith.addf %168, %173 : vector<32x32xf32>
    %175 = vector.extract_strided_slice %149 {offsets = [0, 4, 0], sizes = [2, 16, 32], strides = [1, 1, 1]} : vector<2x20x32xf32> to vector<2x16x32xf32>
    %176 = vector.shape_cast %175 : vector<2x16x32xf32> to vector<32x32xf32>
    %c4_108 = arith.constant 4 : index
    %c0_109 = arith.constant 0 : index
    %c0_110 = arith.constant 0 : index
    %177 = vector.load %arg12[%c4_108, %c0_109, %c0_110] : memref<5x32x32xf32, #tpu.memory_space<vmem>>, vector<1x32x32xf32>
    %178 = vector.shape_cast %177 : vector<1x32x32xf32> to vector<32x32xf32>
    %cst_111 = arith.constant dense<0.000000e+00> : vector<32x32xf32>
    %179 = tpu.matmul %176, %178, %cst_111 {dimension_numbers = #tpu.dot_dimension_numbers<[1], [0], [0], [1], [0, 0, 1, 1], [], []>} : vector<32x32xf32>, vector<32x32xf32>, vector<32x32xf32> -> vector<32x32xf32>
    %180 = arith.addf %174, %179 : vector<32x32xf32>
    %c0_112 = arith.constant 0 : index
    %c0_113 = arith.constant 0 : index
    %181 = vector.load %arg13[%c0_112, %c0_113] : memref<1x32xf32, #tpu.memory_space<vmem>>, vector<1x32xf32>
    %182 = vector.broadcast %181 : vector<1x32xf32> to vector<32x32xf32>
    %183 = arith.addf %180, %182 : vector<32x32xf32>
    %cst_114 = arith.constant 0.000000e+00 : f32
    %184 = vector.broadcast %cst_114 : f32 to vector<32x32xf32>
    %185 = arith.maximumf %183, %184 : vector<32x32xf32>
    %186 = vector.shape_cast %185 : vector<32x32xf32> to vector<2x16x32xf32>
    %187 = vector.shape_cast %186 : vector<2x16x32xf32> to vector<32x32xf32>
    %c0_115 = arith.constant 0 : index
    %c0_116 = arith.constant 0 : index
    %188 = vector.load %arg14[%c0_115, %c0_116] : memref<32x64xf32, #tpu.memory_space<vmem>>, vector<32x64xf32>
    %cst_117 = arith.constant dense<0.000000e+00> : vector<32x64xf32>
    %189 = tpu.matmul %187, %188, %cst_117 {dimension_numbers = #tpu.dot_dimension_numbers<[1], [0], [0], [1], [0, 0, 1, 1], [], []>} : vector<32x32xf32>, vector<32x64xf32>, vector<32x64xf32> -> vector<32x64xf32>
    %c0_118 = arith.constant 0 : index
    %c0_119 = arith.constant 0 : index
    %190 = vector.load %arg15[%c0_118, %c0_119] : memref<1x64xf32, #tpu.memory_space<vmem>>, vector<1x64xf32>
    %191 = vector.broadcast %190 : vector<1x64xf32> to vector<32x64xf32>
    %192 = arith.addf %189, %191 : vector<32x64xf32>
    %cst_120 = arith.constant 0.000000e+00 : f32
    %193 = vector.broadcast %cst_120 : f32 to vector<32x64xf32>
    %194 = arith.maximumf %192, %193 : vector<32x64xf32>
    %c0_121 = arith.constant 0 : index
    %c0_122 = arith.constant 0 : index
    %195 = vector.load %arg16[%c0_121, %c0_122] : memref<64x64xf32, #tpu.memory_space<vmem>>, vector<64x64xf32>
    %cst_123 = arith.constant dense<0.000000e+00> : vector<32x64xf32>
    %196 = tpu.matmul %194, %195, %cst_123 {dimension_numbers = #tpu.dot_dimension_numbers<[1], [0], [0], [1], [0, 0, 1, 1], [], []>} : vector<32x64xf32>, vector<64x64xf32>, vector<32x64xf32> -> vector<32x64xf32>
    %c0_124 = arith.constant 0 : index
    %c0_125 = arith.constant 0 : index
    %197 = vector.load %arg17[%c0_124, %c0_125] : memref<1x64xf32, #tpu.memory_space<vmem>>, vector<1x64xf32>
    %198 = vector.broadcast %197 : vector<1x64xf32> to vector<32x64xf32>
    %199 = arith.addf %196, %198 : vector<32x64xf32>
    %cst_126 = arith.constant 0.000000e+00 : f32
    %200 = vector.broadcast %cst_126 : f32 to vector<32x64xf32>
    %201 = arith.maximumf %199, %200 : vector<32x64xf32>
    %c0_127 = arith.constant 0 : index
    %c0_128 = arith.constant 0 : index
    %202 = vector.load %arg18[%c0_127, %c0_128] : memref<64x8xf32, #tpu.memory_space<vmem>>, vector<64x8xf32>
    %cst_129 = arith.constant dense<0.000000e+00> : vector<32x8xf32>
    %203 = tpu.matmul %201, %202, %cst_129 {dimension_numbers = #tpu.dot_dimension_numbers<[1], [0], [0], [1], [0, 0, 1, 1], [], []>} : vector<32x64xf32>, vector<64x8xf32>, vector<32x8xf32> -> vector<32x8xf32>
    %c0_130 = arith.constant 0 : index
    %c0_131 = arith.constant 0 : index
    %204 = vector.load %arg19[%c0_130, %c0_131] : memref<1x8xf32, #tpu.memory_space<vmem>>, vector<1x8xf32>
    %205 = vector.broadcast %204 : vector<1x8xf32> to vector<32x8xf32>
    %206 = arith.addf %203, %205 : vector<32x8xf32>
    %207 = vector.shape_cast %206 : vector<32x8xf32> to vector<2x16x8xf32>
    %c0_132 = arith.constant 0 : index
    %c0_133 = arith.constant 0 : index
    %c0_134 = arith.constant 0 : index
    %208 = vector.load %arg20[%c0_132, %c0_133, %c0_134] : memref<2x16x8xf32, #tpu.memory_space<vmem>>, vector<2x16x8xf32>
    tpu.vector_store %arg20[%c0_132, %c0_133, %c0_134], %207 {strides = array<i32>} : memref<2x16x8xf32, #tpu.memory_space<vmem>>, vector<2x16x8xf32>,
    return
  }
  func.func @transform_0(%arg0: i32) -> (i32, i32, i32) {
    %c0_i32 = arith.constant 0 : i32
    %c0_i32_0 = arith.constant 0 : i32
    %c0_i32_1 = arith.constant 0 : i32
    return %arg0, %c0_i32, %c0_i32_0 : i32, i32, i32
  }
  func.func @transform_1(%arg0: i32) -> (i32, i32, i32) {
    %c0_i32 = arith.constant 0 : i32
    %c0_i32_0 = arith.constant 0 : i32
    %c0_i32_1 = arith.constant 0 : i32
    %c0_i32_2 = arith.constant 0 : i32
    return %c0_i32, %c0_i32_0, %c0_i32_1 : i32, i32, i32
  }
  func.func @transform_2(%arg0: i32) -> (i32, i32) {
    %c0_i32 = arith.constant 0 : i32
    %c0_i32_0 = arith.constant 0 : i32
    %c0_i32_1 = arith.constant 0 : i32
    return %c0_i32, %c0_i32_0 : i32, i32
  }
  func.func @transform_3(%arg0: i32) -> (i32, i32, i32) {
    %c0_i32 = arith.constant 0 : i32
    %c0_i32_0 = arith.constant 0 : i32
    %c0_i32_1 = arith.constant 0 : i32
    %c0_i32_2 = arith.constant 0 : i32
    return %c0_i32, %c0_i32_0, %c0_i32_1 : i32, i32, i32
  }
  func.func @transform_4(%arg0: i32) -> (i32, i32) {
    %c0_i32 = arith.constant 0 : i32
    %c0_i32_0 = arith.constant 0 : i32
    %c0_i32_1 = arith.constant 0 : i32
    return %c0_i32, %c0_i32_0 : i32, i32
  }
  func.func @transform_5(%arg0: i32) -> (i32, i32, i32) {
    %c0_i32 = arith.constant 0 : i32
    %c0_i32_0 = arith.constant 0 : i32
    %c0_i32_1 = arith.constant 0 : i32
    %c0_i32_2 = arith.constant 0 : i32
    return %c0_i32, %c0_i32_0, %c0_i32_1 : i32, i32, i32
  }
  func.func @transform_6(%arg0: i32) -> (i32, i32) {
    %c0_i32 = arith.constant 0 : i32
    %c0_i32_0 = arith.constant 0 : i32
    %c0_i32_1 = arith.constant 0 : i32
    return %c0_i32, %c0_i32_0 : i32, i32
  }
  func.func @transform_7(%arg0: i32) -> (i32, i32, i32) {
    %c0_i32 = arith.constant 0 : i32
    %c0_i32_0 = arith.constant 0 : i32
    %c0_i32_1 = arith.constant 0 : i32
    %c0_i32_2 = arith.constant 0 : i32
    return %c0_i32, %c0_i32_0, %c0_i32_1 : i32, i32, i32
  }
  func.func @transform_8(%arg0: i32) -> (i32, i32) {
    %c0_i32 = arith.constant 0 : i32
    %c0_i32_0 = arith.constant 0 : i32
    %c0_i32_1 = arith.constant 0 : i32
    return %c0_i32, %c0_i32_0 : i32, i32
  }
  func.func @transform_9(%arg0: i32) -> (i32, i32, i32) {
    %c0_i32 = arith.constant 0 : i32
    %c0_i32_0 = arith.constant 0 : i32
    %c0_i32_1 = arith.constant 0 : i32
    %c0_i32_2 = arith.constant 0 : i32
    return %c0_i32, %c0_i32_0, %c0_i32_1 : i32, i32, i32
  }
  func.func @transform_10(%arg0: i32) -> (i32, i32) {
    %c0_i32 = arith.constant 0 : i32
    %c0_i32_0 = arith.constant 0 : i32
    %c0_i32_1 = arith.constant 0 : i32
    return %c0_i32, %c0_i32_0 : i32, i32
  }
  func.func @transform_11(%arg0: i32) -> (i32, i32, i32) {
    %c0_i32 = arith.constant 0 : i32
    %c0_i32_0 = arith.constant 0 : i32
    %c0_i32_1 = arith.constant 0 : i32
    %c0_i32_2 = arith.constant 0 : i32
    return %c0_i32, %c0_i32_0, %c0_i32_1 : i32, i32, i32
  }
  func.func @transform_12(%arg0: i32) -> (i32, i32) {
    %c0_i32 = arith.constant 0 : i32
    %c0_i32_0 = arith.constant 0 : i32
    %c0_i32_1 = arith.constant 0 : i32
    return %c0_i32, %c0_i32_0 : i32, i32
  }
  func.func @transform_13(%arg0: i32) -> (i32, i32) {
    %c0_i32 = arith.constant 0 : i32
    %c0_i32_0 = arith.constant 0 : i32
    %c0_i32_1 = arith.constant 0 : i32
    return %c0_i32, %c0_i32_0 : i32, i32
  }
  func.func @transform_14(%arg0: i32) -> (i32, i32) {
    %c0_i32 = arith.constant 0 : i32
    %c0_i32_0 = arith.constant 0 : i32
    %c0_i32_1 = arith.constant 0 : i32
    return %c0_i32, %c0_i32_0 : i32, i32
  }
  func.func @transform_15(%arg0: i32) -> (i32, i32) {
    %c0_i32 = arith.constant 0 : i32
    %c0_i32_0 = arith.constant 0 : i32
    %c0_i32_1 = arith.constant 0 : i32
    return %c0_i32, %c0_i32_0 : i32, i32
  }
  func.func @transform_16(%arg0: i32) -> (i32, i32) {
    %c0_i32 = arith.constant 0 : i32
    %c0_i32_0 = arith.constant 0 : i32
    %c0_i32_1 = arith.constant 0 : i32
    return %c0_i32, %c0_i32_0 : i32, i32
  }
  func.func @transform_17(%arg0: i32) -> (i32, i32) {
    %c0_i32 = arith.constant 0 : i32
    %c0_i32_0 = arith.constant 0 : i32
    %c0_i32_1 = arith.constant 0 : i32
    return %c0_i32, %c0_i32_0 : i32, i32
  }
  func.func @transform_18(%arg0: i32) -> (i32, i32) {
    %c0_i32 = arith.constant 0 : i32
    %c0_i32_0 = arith.constant 0 : i32
    %c0_i32_1 = arith.constant 0 : i32
    return %c0_i32, %c0_i32_0 : i32, i32
  }
  func.func @transform_19(%arg0: i32) -> (i32, i32, i32) {
    %c0_i32 = arith.constant 0 : i32
    %c0_i32_0 = arith.constant 0 : i32
    %c0_i32_1 = arith.constant 0 : i32
    return %arg0, %c0_i32, %c0_i32_0 : i32, i32, i32
  }
}

</mosaic_0001>

<bundles_post_ra>
// kernel: tpu_custom_call.1
= control target key start
LH: loop header
LB: loop body
LE: loop exit
PB: predicated region body
PF: predicated region fallthrough
CT: control target
= control target key end

     0   :  { %s3389_s0 = inlined_call_operand.vmem [shape: f32[4,16,8], index: 0, kind: input, shape index: {}]   ;;  %s3390_s1 = inlined_call_operand.hbm [shape: f32[3,8,32], index: 1, kind: input, shape index: {}]   ;;  %s3391_s2 = inlined_call_operand.vmem [shape: f32[1,32], index: 2, kind: input, shape index: {}]   ;;  %s3392_s3 = inlined_call_operand.hbm [shape: f32[3,32,32], index: 3, kind: input, shape index: {}]   ;;  %s3393_s4 = inlined_call_operand.vmem [shape: f32[1,32], index: 4, kind: input, shape index: {}]   ;;  %s3394_s5 = inlined_call_operand.hbm [shape: f32[3,32,32], index: 5, kind: input, shape index: {}]   ;;  %s3395_s6 = inlined_call_operand.vmem [shape: f32[1,32], index: 6, kind: input, shape index: {}]   ;;  %s3396_s7 = inlined_call_operand.hbm [shape: f32[3,32,32], index: 7, kind: input, shape index: {}]   ;;  %s3397_s8 = inlined_call_operand.vmem [shape: f32[1,32], index: 8, kind: input, shape index: {}]   ;;  %s3398_s9 = inlined_call_operand.vmem [shape: f32[5,32,32], index: 9, kind: input, shape index: {}]   ;;  %s3399_s10 = inlined_call_operand.vmem [shape: f32[1,32], index: 10, kind: input, shape index: {}]   ;;  %s3400_s11 = inlined_call_operand.hbm [shape: f32[5,32,32], index: 11, kind: input, shape index: {}]   ;;  %s3401_s12 = inlined_call_operand.vmem [shape: f32[1,32], index: 12, kind: input, shape index: {}]   ;;  %s3402_s13 = inlined_call_operand.hbm [shape: f32[32,64], index: 13, kind: input, shape index: {}]   ;;  %s3403_s14 = inlined_call_operand.vmem [shape: f32[1,64], index: 14, kind: input, shape index: {}]   ;;  %s3404_s15 = inlined_call_operand.hbm [shape: f32[64,64], index: 15, kind: input, shape index: {}]   ;;  %s3405_s16 = inlined_call_operand.vmem [shape: f32[1,64], index: 16, kind: input, shape index: {}]   ;;  %s3406_s17 = inlined_call_operand.vmem [shape: f32[64,8], index: 17, kind: input, shape index: {}]   ;;  %s3407_s18 = inlined_call_operand.vmem [shape: f32[1,8], index: 18, kind: input, shape index: {}]   ;;  %s3408_s19 = inlined_call_operand.vmem [shape: f32[4,16,8], index: 19, kind: output, shape index: {}]  }
   0x1   :  { %3410 = sst [smem:[#allocation17_spill]] %s3389_s0 }
   0x2   :  { %3411 = sst [smem:[#allocation18_spill]] %s3390_s1 }
   0x3   :  { %3412 = sst [smem:[#allocation19_spill]] %s3391_s2 }
   0x4   :  { %3413 = sst [smem:[#allocation20_spill]] %s3392_s3 }
   0x5   :  { %3414 = sst [smem:[#allocation21_spill]] %s3396_s7 }
   0x6   :  { %3415 = sst [smem:[#allocation22_spill]] %s3402_s13 }
   0x7   :  { %3416 = sst [smem:[#allocation23_spill]] %s3408_s19 }
   0x8   :  { %24 = vsyncpa [#allocation3], 0 }
   0x9   :  { %25 = vsyncpa [#allocation5], 0 }
   0xa   :  { %26 = vsyncpa [#allocation8], 0 }
   0xb   :  { %27 = vsyncpa [#allocation11], 0  ;;  %s2928_s0 = smov 0  }
   0xc LB: > { %s3409_s30 = sadd.s32 4294967295, %s2817_s0   ;;  %p2349_p0 = scmp.ge.s32.totalorder %s2817_s0, 1  ;;  %s2817_s0 = sphi %s2928_s0, %s33_s0  }
   0xd   : > { %p468_p1 = scmp.lt.s32.totalorder %s2817_s0, 3  ;;  %p2938_p2 = scmp.eq.s32.totalorder %s3409_s30, 0 }
   0xe   : > { %s3418_s22 = sld [smem:[#allocation20_spill]]  ;;  %s2819_s26 = smov [#allocation4]  }
   0xf   : > { %p2945_p3 = pnand %p2349_p0, %p468_p1  ;;  %s3420_s7 = sld [smem:[#allocation21_spill]] }
  0x10   : > { %s498_s27 = sshll.u32 %s2819_s26, 4  ;;  %s2820_s29 = smov [#allocation7]   ;;  %s499_s27 = int_to_ptr.vmem [resolvable:$true] %s498_s27 }
  0x11   : > { %p2523_p4 = pneg %p2945_p3  ;;  %s532_s21 = sshll.u32 %s2820_s29, 4  ;;  %s533_s21 = int_to_ptr.vmem [resolvable:$true] %s532_s21 }
  0x12   : > { %s3422_s13 = sld [smem:[#allocation22_spill]]  ;;  %s2821_s25 = smov 128  }
  0x13   : > { %p2956_p5 = pnand %p2938_p2, %p2523_p4  ;;  %s2822_s26 = smov 8  }
  0x14   : > { %s496_s2 = sshll.u32 %s3418_s22, 4  ;;  %s2823_s29 = smov [#allocation10]   ;;  %s497_s2 = int_to_ptr.hbm [resolvable:$true] %s496_s2 }
  0x15   : > { %s530_s3 = sshll.u32 %s3420_s7, 4  ;;  %s572_s30 = sshll.u32 %s2823_s29, 4  ;;  %s531_s3 = int_to_ptr.hbm [resolvable:$true] %s530_s3  ;;  %s573_s30 = int_to_ptr.vmem [resolvable:$true] %s572_s30 }
  0x16   : > { %2529 = dma.hbm_to_vmem [thread:$0]  (!%p2956_p5), %s497_s2, 1536, %s499_s27, [#allocation5], %s2821_s25, %s2821_s25, %s2822_s26  }
  0x17   : > { %2535 = dma.hbm_to_vmem [thread:$0]  (!%p2956_p5), %s531_s3, 1536, %s533_s21, [#allocation8], %s2821_s25, %s2821_s25, %s2822_s26  }
  0x18   : > { %s570_s24 = sshll.u32 %s3422_s13, 4  ;;  %s3423_s22 = sld [smem:[#allocation18_spill]]  ;;  %s571_s24 = int_to_ptr.hbm [resolvable:$true] %s570_s24 }
  0x19   : > { %2541 = dma.hbm_to_vmem [thread:$0]  (!%p2956_p5), %s571_s24, 512, %s573_s30, [#allocation11], %s2821_s25, %s2821_s25, %s2822_s26  }
  0x1a   : > { %s513_s19 = sshll.u32 %s3394_s5, 4  ;;  %s2824_s3 = smov [#allocation2]   ;;  %s514_s19 = int_to_ptr.hbm [resolvable:$true] %s513_s19 }
  0x1b   : > { %s481_s21 = sshll.u32 %s2824_s3, 4  ;;  %s2825_s7 = smov [#allocation6]   ;;  %s482_s21 = int_to_ptr.vmem [resolvable:$true] %s481_s21 }
  0x1c   : > { %s515_s29 = sshll.u32 %s2825_s7, 4  ;;  %s553_s30 = sshll.u32 %s3400_s11, 4  ;;  %s516_s29 = int_to_ptr.vmem [resolvable:$true] %s515_s29  ;;  %s554_s30 = int_to_ptr.hbm [resolvable:$true] %s553_s30 }
  0x1d   : > { %2532 = dma.hbm_to_vmem [thread:$0]  (!%p2956_p5), %s514_s19, 1536, %s516_s29, [#allocation5], %s2821_s25, %s2821_s25, %s2822_s26  }
  0x1e   : > { %s479_s13 = sshll.u32 %s3423_s22, 4  ;;  %s587_s27 = sshll.u32 %s3404_s15, 4  ;;  %s480_s13 = int_to_ptr.hbm [resolvable:$true] %s479_s13  ;;  %s588_s27 = int_to_ptr.hbm [resolvable:$true] %s587_s27 }
  0x1f   : > { %2526 = dma.hbm_to_vmem [thread:$0]  (!%p2956_p5), %s480_s13, 384, %s482_s21, [#allocation3], %s2821_s25, %s2821_s25, %s2822_s26  }
  0x20   : > { %s2826_s3 = smov [#allocation9]   ;;  %s2827_s21 = smov [#allocation12]  }
  0x21   : > { %s555_s13 = sshll.u32 %s2826_s3, 4  ;;  %s589_s7 = sshll.u32 %s2827_s21, 4  ;;  %s556_s13 = int_to_ptr.vmem [resolvable:$true] %s555_s13  ;;  %s590_s7 = int_to_ptr.vmem [resolvable:$true] %s589_s7 }
  0x22   : > { %2538 = dma.hbm_to_vmem [thread:$0]  (!%p2956_p5), %s554_s30, 2560, %s556_s13, [#allocation8], %s2821_s25, %s2821_s25, %s2822_s26  }
  0x23   : > { %2544 = dma.hbm_to_vmem [thread:$0]  (!%p2956_p5), %s588_s27, 1024, %s590_s7, [#allocation11], %s2821_s25, %s2821_s25, %s2822_s26  }
  0x24   : > { %624 = sbr.rel (%p2945_p3) target bundleno = 1450 (0x5aa), region = 96 }
  0x29   : > { %2800 = dma.done.wait (%p2938_p2), [#allocation3], 384  }
  0x2a   : > { %2802 = vsyncadd (%p2938_p2), [#allocation3], 4294966912 }
  0x2b   : > { %2804 = dma.done.wait (%p2938_p2), [#allocation5], 3072  }
  0x2c   : > { %2806 = vsyncadd (%p2938_p2), [#allocation5], 4294964224 }
  0x2d   : > { %2808 = dma.done.wait (%p2938_p2), [#allocation8], 4096  }
  0x2e   : > { %2810 = vsyncadd (%p2938_p2), [#allocation8], 4294963200 }
  0x2f   : > { %2812 = dma.done.wait (%p2938_p2), [#allocation11], 1536  }
  0x30   : > { %2814 = vsyncadd (%p2938_p2), [#allocation11], 4294965760  ;;  %s3424_s19 = sadd.s32 4294967295, %s2817_s0   ;;  %s3425_s29 = sld [smem:[#allocation17_spill]]  ;;  %v767_v0 = vld [vmem:[#allocation2 + $0x8] sm:$0xff]  ;;  %vm735_vm0 = vcmask 1040384  }
  0x31   : > { %s2366_s23 = sshll.u32 %s3424_s19, 1  ;;  %2492 = vmatpush.msra.mxu1 %v767_v0  ;;  %2493 = vmatpush.msra.mxu2 %v767_v0  ;;  %vm755_vm1 = vcmask 1046528   ;;  %v855_v7 = vld [vmem:[#allocation2 + $0x10] sm:$0xff]  ;;  %vm768_vm2 = vcmask 64512   ;;  %v750_v10 = vld [vmem:[#allocation2] sm:$0xff]  ;;  %vm843_vm3 = vcmask 1045504  }
  0x32   : > { %p714_p6 = scmp.lt.s32.totalorder %s2366_s23, 3  ;;  %792 = vmatpush.msra.mxu0 %v767_v0  ;;  %2494 = vmatpush.msra.mxu3 %v767_v0  ;;  %v1039_v37 = vld [vmem:[#allocation4 + $0x58] sm:$0xff]  ;;  %v929_v39 = vld [vmem:[#allocation4 + $0x10] sm:$0xff]  ;;  %v928_v40 = vld [vmem:[#allocation4 + $0x8] sm:$0xff]  ;;  %s3426_s30 = sld [smem:[#allocation19_spill]]  ;;  %vm950_vm4 = vcmask 261120  }
  0x33   : > { %879 = vmatpush.msrb.mxu2 %v855_v7  ;;  %829 = vmatpush.msrb.mxu1 %v750_v10  ;;  %v930_v38 = vld [vmem:[#allocation4 + $0x18] sm:$0xff]  ;;  %v1038_v41 = vld [vmem:[#allocation4 + $0x50] sm:$0xff]  ;;  %v927_v42 = vld [vmem:[#allocation4] sm:$0xff]  ;;  %vm1463_vm5 = vcmask 1041408   ;;  %vm1631_vm6 = vcmask 1044480   ;;  %vm1688_vm7 = vcmask 1043456  }
  0x34   : > { %s3429_s23 = smov (!%p714_p6, %s2366_s23), 3  ;;  %1008 = vmatpush.msrb.mxu0 %v930_v38  ;;  %v949_v43 = vld [vmem:[#allocation4 + $0x38] sm:$0xff]  ;;  %v948_v44 = vld [vmem:[#allocation4 + $0x30] sm:$0xff]  ;;  %v1037_v46 = vld [vmem:[#allocation4 + $0x48] sm:$0xff]  ;;  %vm2117_vm8 = vcmask 523264  }
  0x35   : > { %s2490_s28 = sshll.u32 %s3429_s23, 4  ;;  %971 = vmatpush.msrb.mxu3 %v949_v43  ;;  %v947_v47 = vld [vmem:[#allocation4 + $0x28] sm:$0xff]  ;;  %v946_v48 = vld [vmem:[#allocation4 + $0x20] sm:$0xff] }
  0x36   : > { %s718_s1 = scalar_lea.vmem %s3425_s29, %s2490_s28  ;;  %1009 = vmatpush.msrb.mxu0 %v929_v39  ;;  %v1036_v49 = vld [vmem:[#allocation4 + $0x40] sm:$0xff] }
  0x37   : > { %v727_v1 = vld [vmem:[%s718_s1] sm:$0xff]  ;;  %v728_v2 = vld [vmem:[%s718_s1 + $0x8] sm:$0xff]  ;;  %v729_v5 = vld [vmem:[%s718_s1 + $0x10] sm:$0xff]  ;;  %972 = vmatpush.msrb.mxu3 %v948_v44 }
  0x38   : > { %v736_v3 = vrot.slane %v727_v1, 7  ;;  %v737_v4 = vrot.slane %v728_v2, 7  ;;  %v730_v6 = vld [vmem:[%s718_s1 + $0x18] sm:$0xff]  ;;  %v739_v8 = vrot.slane %v729_v5, 7  ;;  %1010 = vmatpush.msrb.mxu0 %v928_v40  ;;  %v2576_v54 = vld [vmem:[%s3426_s30] ss:$0 sm:$0xff] }
  0x39   : > { %v740_v9 = vrot.slane %v730_v6, 7  ;;  %973 = vmatpush.msrb.mxu3 %v947_v47  ;;  %v1133_v44 = vld [vmem:[#allocation6 + $0x38] sm:$0xff]  ;;  %v1113_v47 = vld [vmem:[#allocation6 + $0x10] sm:$0xff]  ;;  %s3427_s30 = sld [smem:[#allocation23_spill]] }
  0x3a   : > { %v738_v11 = vsel %vm735_vm0, %v736_v3, %v737_v4  ;;  %v748_v12 = vsel %vm735_vm0, %v737_v4, 0.0  ;;  %v746_v13 = vsel %vm735_vm0, 0.0, %v736_v3  ;;  %v747_v17 = vsel %vm735_vm0, 0.0, %v739_v8  ;;  %1011 = vmatpush.msrb.mxu0 %v927_v42 }
  0x3b   : > { %v757_v14 = vrot.slane %v738_v11, 1  ;;  %v759_v15 = vrot.slane %v748_v12, 1  ;;  %v741_v16 = vsel %vm735_vm0, %v739_v8, %v740_v9  ;;  %v761_v18 = vrot.slane %v747_v17, 1  ;;  %974 = vmatpush.msrb.mxu3 %v946_v48  ;;  %v1222_v48 = vld [vmem:[#allocation6 + $0x58] sm:$0xff] }
  0x3c   : > { %v762_v19 = vrot.slane %v741_v16, 1  ;;  %v756_v20 = vrot.slane %v746_v13, 1  ;;  %v749_v24 = vsel %vm735_vm0, %v740_v9, 0.0  ;;  %v844_v26 = vrot.slane %v746_v13, 2 }
  0x3d   : > { %v760_v21 = vsel %vm755_vm1, %v757_v14, %v759_v15  ;;  %v764_v25 = vrot.slane %v749_v24, 1  ;;  %v845_v27 = vrot.slane %v738_v11, 2  ;;  %v847_v30 = vrot.slane %v748_v12, 2 }
  0x3e   : > { %2373 = vmatmul.msk.f32.vlgmr.msra.gmra.mxu1 %vm768_vm2, %v760_v21  ;;  %v763_v22 = vsel %vm755_vm1, %v761_v18, %v762_v19  ;;  %v758_v23 = vsel %vm755_vm1, %v756_v20, %v757_v14  ;;  %v849_v32 = vrot.slane %v747_v17, 2  ;;  %v850_v33 = vrot.slane %v741_v16, 2 }
  0x3f   : > { %2374 = vmatmul.msk.f32.vlgmr.msra.gmra.mxu2 %vm768_vm2, %v763_v22  ;;  %2372 = vmatmul.msk.f32.vlgmr.msra.gmra.mxu0 %vm768_vm2, %v758_v23  ;;  %v765_v28 = vsel %vm755_vm1, %v762_v19, %v764_v25  ;;  %v846_v29 = vsel %vm843_vm3, %v844_v26, %v845_v27  ;;  %v848_v31 = vsel %vm843_vm3, %v845_v27, %v847_v30  ;;  %v852_v35 = vrot.slane %v749_v24, 2  ;;  %s725_s24 = scalar_lea.vmem %s3427_s30, %s2490_s28 }
  0x40   : > { %2375 = vmatmul.msk.f32.vlgmr.msra.gmra.mxu3 %vm768_vm2, %v765_v28  ;;  %v851_v34 = vsel %vm843_vm3, %v849_v32, %v850_v33  ;;  %1060 = vmatpush.msra.mxu1 %v1039_v37 }
  0x41   : > { %v853_v36 = vsel %vm843_vm3, %v850_v33, %v852_v35  ;;  %1154 = vmatpush.msra.mxu2 %v1133_v44  ;;  %1243 = vmatpush.msra.mxu0 %v1222_v48 }
  0x42   : > { %1061 = vmatpush.msra.mxu1 %v1038_v41 }
  0x44   : > { %1062 = vmatpush.msra.mxu1 %v1037_v46  ;;  %v1132_v46 = vld [vmem:[#allocation6 + $0x30] sm:$0xff] }
  0x45   : > { %1155 = vmatpush.msra.mxu2 %v1132_v46 }
  0x46   : > { %2376 = vmatmul.msk.f32.vlgmr.msrb.gmra.mxu1 %vm768_vm2, %v746_v13 }
  0x47   : > { %2380 = vmatmul.msk.f32.vlgmr.msrb.gmra.mxu2 %vm768_vm2, %v846_v29  ;;  %1063 = vmatpush.msra.mxu1 %v1036_v49  ;;  %v1131_v49 = vld [vmem:[#allocation6 + $0x28] sm:$0xff] }
  0x48   : > { %1156 = vmatpush.msra.mxu2 %v1131_v49 }
  0x4e   : > { %2377 = vmatmul.msk.f32.gmra.mxu1 %vm768_vm2, %v738_v11 }
  0x4f   : > { %2381 = vmatmul.msk.f32.gmra.mxu2 %vm768_vm2, %v848_v31 }
  0x56   : > { %2378 = vmatmul.msk.f32.gmra.mxu1 %vm768_vm2, %v747_v17 }
  0x57   : > { %2382 = vmatmul.msk.f32.gmra.mxu2 %vm768_vm2, %v851_v34 }
  0x5e   : > { %2379 = vmatmul.msk.f32.gmra.mxu1 %vm768_vm2, %v741_v16 }
  0x5f   : > { %2383 = vmatmul.msk.f32.gmra.mxu2 %vm768_vm2, %v853_v36 }
  0xbb   : > { %v797_v45 = vpop.f32.mrf.mxu1 }
  0xbc   : > { %v794_v52 = vpop.f32.mrf.mxu0 }
  0xc2   : > { %v800_v50 = vpop.f32.mrf.mxu2 }
  0xc3   : > { %v831_v51 = vpop.f32.mrf.mxu1  ;;  %v803_v13 = vpop.f32.mrf.mxu3 }
  0xc4   : > { %v832_v53 = vadd.f32 %v831_v51, %v794_v52  ;;  %v1221_v51 = vld [vmem:[#allocation6 + $0x50] sm:$0xff]  ;;  %v1111_v52 = vld [vmem:[#allocation6] sm:$0xff] }
  0xc5   : > { %1244 = vmatpush.msra.mxu0 %v1221_v51  ;;  %v1297_v51 = vld [vmem:[#allocation7 + $0x18] sm:$0xff] }
  0xca   : > { %v881_v55 = vpop.f32.mrf.mxu2 }
  0xcb   : > { %v893_v56 = vadd.f32 %v881_v55, %v832_v53  ;;  %v834_v57 = vpop.f32.mrf.mxu1  ;;  %v1130_v53 = vld [vmem:[#allocation6 + $0x20] sm:$0xff] }
  0xcc   : > { %v835_v61 = vadd.f32 %v834_v57, %v797_v45  ;;  %v1114_v45 = vld [vmem:[#allocation6 + $0x18] sm:$0xff]  ;;  %1157 = vmatpush.msra.mxu2 %v1130_v53  ;;  %v1219_v55 = vld [vmem:[#allocation6 + $0x40] sm:$0xff] }
  0xcd   : > { %v901_v58 = vadd.f32 %v2576_v54, %v893_v56  ;;  %1191 = vmatpush.msra.mxu3 %v1114_v45  ;;  %v1316_v53 = vld [vmem:[#allocation7 + $0x38] sm:$0xff] }
  0xce   : > { %1374 = vmatpush.msrb.mxu2 %v1297_v51  ;;  %1337 = vmatpush.msrb.mxu1 %v1316_v53 }
  0xcf   : > { %v905_v59 = vmax.f32 %v901_v58, 0.0  ;;  %1192 = vmatpush.msra.mxu3 %v1113_v47 }
  0xd1   : > { %v913_v60 = vrot.slane %v905_v59, 7 }
  0xd2   : > { %v884_v62 = vpop.f32.mrf.mxu2 }
  0xd3   : > { %v894_v63 = vadd.f32 %v884_v62, %v835_v61  ;;  %v923_v0 = vsel %vm735_vm0, 0.0, %v913_v60  ;;  %v837_v1 = vpop.f32.mrf.mxu1 }
  0xd4   : > { %2388 = vmatmul.msk.f32.vlgmr.msrb.gmra.mxu0 %vm950_vm4, %v923_v0  ;;  %v838_v5 = vadd.f32 %v837_v1, %v800_v50  ;;  %v935_v9 = vrot.slane %v923_v0, 1  ;;  %v1025_v10 = vrot.slane %v923_v0, 2  ;;  %v1112_v50 = vld [vmem:[#allocation6 + $0x8] sm:$0xff] }
  0xd5   : > { %v902_v2 = vadd.f32 %v2576_v54, %v894_v63  ;;  %1193 = vmatpush.msra.mxu3 %v1112_v50 }
  0xd7   : > { %v906_v3 = vmax.f32 %v902_v2, 0.0  ;;  %1194 = vmatpush.msra.mxu3 %v1111_v52  ;;  %v1405_v52 = vld [vmem:[#allocation7 + $0x58] sm:$0xff] }
  0xd9   : > { %v914_v4 = vrot.slane %v906_v3, 7 }
  0xda   : > { %v887_v6 = vpop.f32.mrf.mxu2 }
  0xdb   : > { %v895_v7 = vadd.f32 %v887_v6, %v838_v5  ;;  %v915_v8 = vsel %vm735_vm0, %v913_v60, %v914_v4  ;;  %v840_v14 = vpop.f32.mrf.mxu1  ;;  %v925_v18 = vsel %vm735_vm0, %v914_v4, 0.0  ;;  %v2577_v60 = vld [vmem:[%s3393_s4] ss:$0 sm:$0xff] }
  0xdc   : > { %v936_v11 = vrot.slane %v915_v8, 1  ;;  %2389 = vmatmul.msk.f32.gmra.mxu0 %vm950_vm4, %v915_v8  ;;  %v1026_v12 = vrot.slane %v915_v8, 2  ;;  %v841_v20 = vadd.f32 %v840_v14, %v803_v13  ;;  %v938_v23 = vrot.slane %v925_v18, 1 }
  0xdd   : > { %v903_v15 = vadd.f32 %v2576_v54, %v895_v7  ;;  %v1028_v24 = vrot.slane %v925_v18, 2 }
  0xde   : > { %v937_v16 = vsel %vm755_vm1, %v935_v9, %v936_v11  ;;  %v1027_v17 = vsel %vm843_vm3, %v1025_v10, %v1026_v12  ;;  %v939_v28 = vsel %vm755_vm1, %v936_v11, %v938_v23 }
  0xdf   : > { %v907_v19 = vmax.f32 %v903_v15, 0.0  ;;  %2384 = vmatmul.msk.f32.vlgmr.msrb.gmra.mxu3 %vm950_vm4, %v937_v16  ;;  %2392 = vmatmul.msk.f32.vlgmr.msra.gmra.mxu1 %vm950_vm4, %v1027_v17  ;;  %v1029_v29 = vsel %vm843_vm3, %v1026_v12, %v1028_v24 }
  0xe0   : > { %1426 = vmatpush.msrb.mxu3 %v1405_v52 }
  0xe1   : > { %v916_v21 = vrot.slane %v907_v19, 7 }
  0xe2   : > { %v890_v22 = vpop.f32.mrf.mxu2 }
  0xe3   : > { %v896_v25 = vadd.f32 %v890_v22, %v841_v20  ;;  %v924_v26 = vsel %vm735_vm0, 0.0, %v916_v21 }
  0xe4   : > { %2390 = vmatmul.msk.f32.gmra.mxu0 %vm950_vm4, %v924_v26  ;;  %v940_v33 = vrot.slane %v924_v26, 1  ;;  %v1030_v34 = vrot.slane %v924_v26, 2 }
  0xe5   : > { %v904_v27 = vadd.f32 %v2576_v54, %v896_v25  ;;  %v1220_v54 = vld [vmem:[#allocation6 + $0x48] sm:$0xff] }
  0xe6   : > { %1245 = vmatpush.msra.mxu0 %v1220_v54  ;;  %v1296_v54 = vld [vmem:[#allocation7 + $0x10] sm:$0xff] }
  0xe7   : > { %v908_v30 = vmax.f32 %v904_v27, 0.0  ;;  %2385 = vmatmul.msk.f32.gmra.mxu3 %vm950_vm4, %v939_v28  ;;  %2393 = vmatmul.msk.f32.gmra.mxu1 %vm950_vm4, %v1029_v29 }
  0xe8   : > { %1246 = vmatpush.msra.mxu0 %v1219_v55  ;;  %v1404_v55 = vld [vmem:[#allocation7 + $0x50] sm:$0xff]  ;;  %1375 = vmatpush.msrb.mxu2 %v1296_v54 }
  0xe9   : > { %v917_v31 = vrot.slane %v908_v30, 7  ;;  %1427 = vmatpush.msrb.mxu3 %v1404_v55 }
  0xeb   : > { %v918_v32 = vsel %vm735_vm0, %v916_v21, %v917_v31  ;;  %v926_v39 = vsel %vm735_vm0, %v917_v31, 0.0 }
  0xec   : > { %v941_v35 = vrot.slane %v918_v32, 1  ;;  %2391 = vmatmul.msk.f32.gmra.mxu0 %vm950_vm4, %v918_v32  ;;  %v1031_v36 = vrot.slane %v918_v32, 2  ;;  %v943_v40 = vrot.slane %v926_v39, 1  ;;  %v1033_v41 = vrot.slane %v926_v39, 2 }
  0xee   : > { %v942_v37 = vsel %vm755_vm1, %v940_v33, %v941_v35  ;;  %v1032_v38 = vsel %vm843_vm3, %v1030_v34, %v1031_v36  ;;  %v944_v42 = vsel %vm755_vm1, %v941_v35, %v943_v40  ;;  %v1034_v43 = vsel %vm843_vm3, %v1031_v36, %v1033_v41 }
  0xef   : > { %2386 = vmatmul.msk.f32.gmra.mxu3 %vm950_vm4, %v942_v37  ;;  %2394 = vmatmul.msk.f32.gmra.mxu1 %vm950_vm4, %v1032_v38 }
  0xf7   : > { %2387 = vmatmul.msk.f32.gmra.mxu3 %vm950_vm4, %v944_v42  ;;  %2395 = vmatmul.msk.f32.gmra.mxu1 %vm950_vm4, %v1034_v43 }
 0x151   : > { %v1013_v56 = vpop.f32.mrf.mxu0 }
 0x159   : > { %v1016_v62 = vpop.f32.mrf.mxu0 }
 0x15c   : > { %v1065_v57 = vpop.f32.mrf.mxu1 }
 0x161   : > { %v1019_v8 = vpop.f32.mrf.mxu0 }
 0x162   : > { %v976_v58 = vpop.f32.mrf.mxu3 }
 0x163   : > { %v1014_v59 = vadd.f32 %v1013_v56, %v976_v58  ;;  %v1315_v56 = vld [vmem:[#allocation7 + $0x30] sm:$0xff]  ;;  %v1403_v58 = vld [vmem:[#allocation7 + $0x48] sm:$0xff] }
 0x164   : > { %v1068_v0 = vpop.f32.mrf.mxu1  ;;  %1338 = vmatpush.msrb.mxu1 %v1315_v56  ;;  %1428 = vmatpush.msrb.mxu3 %v1403_v58  ;;  %v2423_v58 = vld [vmem:[%s3398_s9 + $0x38] sm:$0xff] }
 0x165   : > { %v1077_v61 = vadd.f32 %v1065_v57, %v1014_v59  ;;  %v1295_v57 = vld [vmem:[#allocation7 + $0x8] sm:$0xff]  ;;  %v1294_v59 = vld [vmem:[#allocation7] sm:$0xff]  ;;  %1521 = vmatpush.msrb.mxu0 %v2423_v58 }
 0x166   : > { %1376 = vmatpush.msrb.mxu2 %v1295_v57 }
 0x167   : > { %v1085_v63 = vadd.f32 %v2577_v60, %v1077_v61  ;;  %v1402_v61 = vld [vmem:[#allocation7 + $0x40] sm:$0xff] }
 0x168   : > { %1377 = vmatpush.msrb.mxu2 %v1294_v59  ;;  %1429 = vmatpush.msrb.mxu3 %v1402_v61  ;;  %v2422_v59 = vld [vmem:[%s3398_s9 + $0x30] sm:$0xff] }
 0x169   : > { %v1089_v1 = vmax.f32 %v1085_v63, 0.0  ;;  %v1022_v25 = vpop.f32.mrf.mxu0  ;;  %1522 = vmatpush.msrb.mxu0 %v2422_v59  ;;  %v1480_v61 = vld [vmem:[%s3398_s9 + $0x10] sm:$0xff] }
 0x16a   : > { %v979_v2 = vpop.f32.mrf.mxu3 }
 0x16b   : > { %v1097_v3 = vrot.slane %v1089_v1, 7  ;;  %v1017_v4 = vadd.f32 %v1016_v62, %v979_v2  ;;  %v1313_v62 = vld [vmem:[#allocation7 + $0x20] sm:$0xff] }
 0x16c   : > { %v1071_v10 = vpop.f32.mrf.mxu1 }
 0x16d   : > { %v1078_v5 = vadd.f32 %v1068_v0, %v1017_v4  ;;  %v1107_v6 = vsel %vm735_vm0, 0.0, %v1097_v3 }
 0x16e   : > { %2400 = vmatmul.msk.f32.vlgmr.msra.gmra.mxu3 %vm950_vm4, %v1107_v6  ;;  %v1119_v16 = vrot.slane %v1107_v6, 1  ;;  %v1208_v17 = vrot.slane %v1107_v6, 2 }
 0x16f   : > { %v1086_v7 = vadd.f32 %v2577_v60, %v1078_v5 }
 0x171   : > { %v1090_v9 = vmax.f32 %v1086_v7, 0.0 }
 0x172   : > { %v982_v11 = vpop.f32.mrf.mxu3 }
 0x173   : > { %v1098_v12 = vrot.slane %v1090_v9, 7  ;;  %v1020_v13 = vadd.f32 %v1019_v8, %v982_v11 }
 0x174   : > { %v1074_v29 = vpop.f32.mrf.mxu1 }
 0x175   : > { %v1079_v14 = vadd.f32 %v1071_v10, %v1020_v13  ;;  %v1099_v15 = vsel %vm735_vm0, %v1097_v3, %v1098_v12  ;;  %v1109_v24 = vsel %vm735_vm0, %v1098_v12, 0.0  ;;  %v2578_v3 = vld [vmem:[%s3395_s6] ss:$0 sm:$0xff] }
 0x176   : > { %v1120_v18 = vrot.slane %v1099_v15, 1  ;;  %2401 = vmatmul.msk.f32.gmra.mxu3 %vm950_vm4, %v1099_v15  ;;  %v1209_v19 = vrot.slane %v1099_v15, 2  ;;  %v1122_v30 = vrot.slane %v1109_v24, 1  ;;  %v1211_v31 = vrot.slane %v1109_v24, 2 }
 0x177   : > { %v1087_v20 = vadd.f32 %v2577_v60, %v1079_v14 }
 0x178   : > { %v1121_v21 = vsel %vm755_vm1, %v1119_v16, %v1120_v18  ;;  %v1210_v22 = vsel %vm843_vm3, %v1208_v17, %v1209_v19  ;;  %v1123_v35 = vsel %vm755_vm1, %v1120_v18, %v1122_v30  ;;  %v1212_v36 = vsel %vm843_vm3, %v1209_v19, %v1211_v31 }
 0x179   : > { %2396 = vmatmul.msk.f32.vlgmr.msra.gmra.mxu2 %vm950_vm4, %v1121_v21  ;;  %2404 = vmatmul.msk.f32.vlgmr.msra.gmra.mxu0 %vm950_vm4, %v1210_v22  ;;  %v1091_v23 = vmax.f32 %v1087_v20, 0.0 }
 0x17a   : > { %v985_v26 = vpop.f32.mrf.mxu3 }
 0x17b   : > { %v1023_v27 = vadd.f32 %v1022_v25, %v985_v26  ;;  %v1100_v28 = vrot.slane %v1091_v23, 7 }
 0x17d   : > { %v1080_v32 = vadd.f32 %v1074_v29, %v1023_v27  ;;  %v1108_v33 = vsel %vm735_vm0, 0.0, %v1100_v28 }
 0x17e   : > { %2402 = vmatmul.msk.f32.gmra.mxu3 %vm950_vm4, %v1108_v33  ;;  %v1124_v40 = vrot.slane %v1108_v33, 1  ;;  %v1213_v41 = vrot.slane %v1108_v33, 2 }
 0x17f   : > { %v1088_v34 = vadd.f32 %v2577_v60, %v1080_v32  ;;  %v1314_v60 = vld [vmem:[#allocation7 + $0x28] sm:$0xff] }
 0x180   : > { %1339 = vmatpush.msrb.mxu1 %v1314_v60  ;;  %v1481_v60 = vld [vmem:[%s3398_s9 + $0x18] sm:$0xff] }
 0x181   : > { %v1092_v37 = vmax.f32 %v1088_v34, 0.0  ;;  %2397 = vmatmul.msk.f32.gmra.mxu2 %vm950_vm4, %v1123_v35  ;;  %2405 = vmatmul.msk.f32.gmra.mxu0 %vm950_vm4, %v1212_v36 }
 0x182   : > { %1340 = vmatpush.msrb.mxu1 %v1313_v62  ;;  %v1479_v62 = vld [vmem:[%s3398_s9 + $0x8] sm:$0xff] }
 0x183   : > { %v1101_v38 = vrot.slane %v1092_v37, 7 }
 0x184   : > { %1558 = vmatpush.msra.mxu1 %v1481_v60 }
 0x185   : > { %v1102_v39 = vsel %vm735_vm0, %v1100_v28, %v1101_v38  ;;  %v1110_v46 = vsel %vm735_vm0, %v1101_v38, 0.0 }
 0x186   : > { %v1125_v42 = vrot.slane %v1102_v39, 1  ;;  %2403 = vmatmul.msk.f32.gmra.mxu3 %vm950_vm4, %v1102_v39  ;;  %v1214_v43 = vrot.slane %v1102_v39, 2  ;;  %v1127_v47 = vrot.slane %v1110_v46, 1  ;;  %v1216_v48 = vrot.slane %v1110_v46, 2  ;;  %1559 = vmatpush.msra.mxu1 %v1480_v61 }
 0x188   : > { %v1126_v44 = vsel %vm755_vm1, %v1124_v40, %v1125_v42  ;;  %v1215_v45 = vsel %vm843_vm3, %v1213_v41, %v1214_v43  ;;  %v1128_v49 = vsel %vm755_vm1, %v1125_v42, %v1127_v47  ;;  %v1217_v50 = vsel %vm843_vm3, %v1214_v43, %v1216_v48  ;;  %1560 = vmatpush.msra.mxu1 %v1479_v62 }
 0x189   : > { %2398 = vmatmul.msk.f32.gmra.mxu2 %vm950_vm4, %v1126_v44  ;;  %2406 = vmatmul.msk.f32.gmra.mxu0 %vm950_vm4, %v1215_v45 }
 0x191   : > { %2399 = vmatmul.msk.f32.gmra.mxu2 %vm950_vm4, %v1128_v49  ;;  %2407 = vmatmul.msk.f32.gmra.mxu0 %vm950_vm4, %v1217_v50 }
 0x1f1   : > { %v1196_v63 = vpop.f32.mrf.mxu3 }
 0x1f6   : > { %v1248_v0 = vpop.f32.mrf.mxu0 }
 0x1f9   : > { %v1199_v5 = vpop.f32.mrf.mxu3 }
 0x1fc   : > { %v1159_v1 = vpop.f32.mrf.mxu2 }
 0x1fd   : > { %v1197_v2 = vadd.f32 %v1196_v63, %v1159_v1  ;;  %v2421_v63 = vld [vmem:[%s3398_s9 + $0x28] sm:$0xff]  ;;  %v2435_v1 = vld [vmem:[%s3398_s9 + $0x58] sm:$0xff] }
 0x1fe   : > { %v1251_v7 = vpop.f32.mrf.mxu0  ;;  %1523 = vmatpush.msrb.mxu0 %v2421_v63  ;;  %1610 = vmatpush.msra.mxu2 %v2435_v1 }
 0x1ff   : > { %v1260_v4 = vadd.f32 %v1248_v0, %v1197_v2  ;;  %v1478_v0 = vld [vmem:[%s3398_s9] sm:$0xff]  ;;  %v2443_v2 = vld [vmem:[%s3398_s9 + $0x78] sm:$0xff] }
 0x200   : > { %1561 = vmatpush.msra.mxu1 %v1478_v0  ;;  %1667 = vmatpush.msra.mxu3 %v2443_v2 }
 0x201   : > { %v1268_v6 = vadd.f32 %v2578_v3, %v1260_v4  ;;  %v1202_v15 = vpop.f32.mrf.mxu3  ;;  %v2442_v4 = vld [vmem:[%s3398_s9 + $0x70] sm:$0xff] }
 0x202   : > { %1668 = vmatpush.msra.mxu3 %v2442_v4 }
 0x203   : > { %v1272_v8 = vmax.f32 %v1268_v6, 0.0  ;;  %v2433_v6 = vld [vmem:[%s3398_s9 + $0x48] sm:$0xff] }
 0x204   : > { %v1162_v9 = vpop.f32.mrf.mxu2 }
 0x205   : > { %v1280_v10 = vrot.slane %v1272_v8, 7  ;;  %v1200_v11 = vadd.f32 %v1199_v5, %v1162_v9  ;;  %v2420_v5 = vld [vmem:[%s3398_s9 + $0x20] sm:$0xff] }
 0x206   : > { %v1254_v17 = vpop.f32.mrf.mxu0  ;;  %1524 = vmatpush.msrb.mxu0 %v2420_v5  ;;  %v2432_v8 = vld [vmem:[%s3398_s9 + $0x40] sm:$0xff] }
 0x207   : > { %v1261_v12 = vadd.f32 %v1251_v7, %v1200_v11  ;;  %v1290_v13 = vsel %vm735_vm0, 0.0, %v1280_v10  ;;  %v2441_v7 = vld [vmem:[%s3398_s9 + $0x68] sm:$0xff]  ;;  %v2440_v9 = vld [vmem:[%s3398_s9 + $0x60] sm:$0xff]  ;;  %v2451_v11 = vld [vmem:[%s3398_s9 + $0x98] sm:$0xff] }
 0x208   : > { %2412 = vmatmul.msk.f32.vlgmr.msrb.gmra.mxu2 %vm950_vm4, %v1290_v13  ;;  %v1302_v23 = vrot.slane %v1290_v13, 1  ;;  %v1391_v24 = vrot.slane %v1290_v13, 2  ;;  %1669 = vmatpush.msra.mxu3 %v2441_v7 }
 0x209   : > { %v1269_v14 = vadd.f32 %v2578_v3, %v1261_v12  ;;  %v1205_v32 = vpop.f32.mrf.mxu3  ;;  %1724 = vmatpush.msra.mxu0 %v2451_v11 }
 0x20a   : > { %1670 = vmatpush.msra.mxu3 %v2440_v9 }
 0x20b   : > { %v1273_v16 = vmax.f32 %v1269_v14, 0.0  ;;  %v2579_v14 = vld [vmem:[%s3397_s8] ss:$0 sm:$0xff] }
 0x20c   : > { %v1165_v18 = vpop.f32.mrf.mxu2 }
 0x20d   : > { %v1281_v19 = vrot.slane %v1273_v16, 7  ;;  %v1203_v20 = vadd.f32 %v1202_v15, %v1165_v18 }
 0x20e   : > { %v1257_v36 = vpop.f32.mrf.mxu0 }
 0x20f   : > { %v1262_v21 = vadd.f32 %v1254_v17, %v1203_v20  ;;  %v1282_v22 = vsel %vm735_vm0, %v1280_v10, %v1281_v19  ;;  %v1292_v31 = vsel %vm735_vm0, %v1281_v19, 0.0  ;;  %v2450_v17 = vld [vmem:[%s3398_s9 + $0x90] sm:$0xff] }
 0x210   : > { %v1303_v25 = vrot.slane %v1282_v22, 1  ;;  %2413 = vmatmul.msk.f32.gmra.mxu2 %vm950_vm4, %v1282_v22  ;;  %v1392_v26 = vrot.slane %v1282_v22, 2  ;;  %v1305_v37 = vrot.slane %v1292_v31, 1  ;;  %v1394_v38 = vrot.slane %v1292_v31, 2  ;;  %1725 = vmatpush.msra.mxu0 %v2450_v17  ;;  %v2449_v22 = vld [vmem:[%s3398_s9 + $0x88] sm:$0xff] }
 0x211   : > { %v1270_v27 = vadd.f32 %v2578_v3, %v1262_v21 }
 0x212   : > { %v1304_v28 = vsel %vm755_vm1, %v1302_v23, %v1303_v25  ;;  %v1393_v29 = vsel %vm843_vm3, %v1391_v24, %v1392_v26  ;;  %v1306_v42 = vsel %vm755_vm1, %v1303_v25, %v1305_v37  ;;  %v1395_v43 = vsel %vm843_vm3, %v1392_v26, %v1394_v38  ;;  %1726 = vmatpush.msra.mxu0 %v2449_v22 }
 0x213   : > { %2408 = vmatmul.msk.f32.vlgmr.msrb.gmra.mxu1 %vm950_vm4, %v1304_v28  ;;  %2416 = vmatmul.msk.f32.vlgmr.msrb.gmra.mxu3 %vm950_vm4, %v1393_v29  ;;  %v1274_v30 = vmax.f32 %v1270_v27, 0.0 }
 0x214   : > { %v1168_v33 = vpop.f32.mrf.mxu2 }
 0x215   : > { %v1206_v34 = vadd.f32 %v1205_v32, %v1168_v33  ;;  %v1283_v35 = vrot.slane %v1274_v30, 7  ;;  %v2448_v32 = vld [vmem:[%s3398_s9 + $0x80] sm:$0xff] }
 0x216   : > { %1727 = vmatpush.msra.mxu0 %v2448_v32  ;;  %v1778_v32 = vld [vmem:[#allocation9 + $0x18] sm:$0xff] }
 0x217   : > { %v1263_v39 = vadd.f32 %v1257_v36, %v1206_v34  ;;  %v1291_v40 = vsel %vm735_vm0, 0.0, %v1283_v35 }
 0x218   : > { %2414 = vmatmul.msk.f32.gmra.mxu2 %vm950_vm4, %v1291_v40  ;;  %v1307_v47 = vrot.slane %v1291_v40, 1  ;;  %v1396_v48 = vrot.slane %v1291_v40, 2 }
 0x219   : > { %v1271_v41 = vadd.f32 %v2578_v3, %v1263_v39  ;;  %v2434_v3 = vld [vmem:[%s3398_s9 + $0x50] sm:$0xff] }
 0x21a   : > { %1611 = vmatpush.msra.mxu2 %v2434_v3 }
 0x21b   : > { %v1275_v44 = vmax.f32 %v1271_v41, 0.0  ;;  %2409 = vmatmul.msk.f32.gmra.mxu1 %vm950_vm4, %v1306_v42  ;;  %2417 = vmatmul.msk.f32.gmra.mxu3 %vm950_vm4, %v1395_v43 }
 0x21c   : > { %1612 = vmatpush.msra.mxu2 %v2433_v6 }
 0x21d   : > { %v1284_v45 = vrot.slane %v1275_v44, 7 }
 0x21e   : > { %1613 = vmatpush.msra.mxu2 %v2432_v8 }
 0x21f   : > { %v1285_v46 = vsel %vm735_vm0, %v1283_v35, %v1284_v45  ;;  %v1293_v53 = vsel %vm735_vm0, %v1284_v45, 0.0 }
 0x220   : > { %v1308_v49 = vrot.slane %v1285_v46, 1  ;;  %2415 = vmatmul.msk.f32.gmra.mxu2 %vm950_vm4, %v1285_v46  ;;  %v1397_v50 = vrot.slane %v1285_v46, 2  ;;  %v1310_v54 = vrot.slane %v1293_v53, 1  ;;  %v1399_v55 = vrot.slane %v1293_v53, 2 }
 0x221   : > { %1855 = vmatpush.msrb.mxu2 %v1778_v32 }
 0x222   : > { %v1309_v51 = vsel %vm755_vm1, %v1307_v47, %v1308_v49  ;;  %v1398_v52 = vsel %vm843_vm3, %v1396_v48, %v1397_v50  ;;  %v1311_v56 = vsel %vm755_vm1, %v1308_v49, %v1310_v54  ;;  %v1400_v57 = vsel %vm843_vm3, %v1397_v50, %v1399_v55 }
 0x223   : > { %2410 = vmatmul.msk.f32.gmra.mxu1 %vm950_vm4, %v1309_v51  ;;  %2418 = vmatmul.msk.f32.gmra.mxu3 %vm950_vm4, %v1398_v52 }
 0x22b   : > { %2411 = vmatmul.msk.f32.gmra.mxu1 %vm950_vm4, %v1311_v56  ;;  %2419 = vmatmul.msk.f32.gmra.mxu3 %vm950_vm4, %v1400_v57 }
 0x28b   : > { %v1379_v10 = vpop.f32.mrf.mxu2 }
 0x290   : > { %v1342_v12 = vpop.f32.mrf.mxu1 }
 0x291   : > { %v1380_v13 = vadd.f32 %v1379_v10, %v1342_v12 }
 0x293   : > { %v1382_v18 = vpop.f32.mrf.mxu2 }
 0x296   : > { %v1431_v15 = vpop.f32.mrf.mxu3 }
 0x297   : > { %v1443_v16 = vadd.f32 %v1431_v15, %v1380_v13 }
 0x298   : > { %v1345_v19 = vpop.f32.mrf.mxu1 }
 0x299   : > { %v1451_v20 = vadd.f32 %v2579_v14, %v1443_v16  ;;  %v1383_v24 = vadd.f32 %v1382_v18, %v1345_v19 }
 0x29b   : > { %v1455_v21 = vmax.f32 %v1451_v20, 0.0  ;;  %v1385_v30 = vpop.f32.mrf.mxu2 }
 0x29d   : > { %v1464_v23 = vrot.slane %v1455_v21, 6 }
 0x29e   : > { %v1434_v25 = vpop.f32.mrf.mxu3 }
 0x29f   : > { %v3212_v26 = vsel %vm1463_vm5, 0.0, %v1464_v23  ;;  %v1444_v27 = vadd.f32 %v1434_v25, %v1383_v24 }
 0x2a0   : > { %v1348_v28 = vpop.f32.mrf.mxu1  ;;  %2428 = vmatmul.msk.f32.vlgmr.msra.gmra.mxu1 %vm950_vm4, %v3212_v26  ;;  %v1486_v38 = vrot.slane %v3212_v26, 1  ;;  %v1575_v39 = vrot.slane %v3212_v26, 2  ;;  %v1632_v42 = vrot.slane %v3212_v26, 3  ;;  %v1689_v20 = vrot.slane %v3212_v26, 4  ;;  %v1797_v26 = vld [vmem:[#allocation9 + $0x38] sm:$0xff] }
 0x2a1   : > { %v1452_v29 = vadd.f32 %v2579_v14, %v1444_v27  ;;  %v1386_v34 = vadd.f32 %v1385_v30, %v1348_v28  ;;  %1818 = vmatpush.msrb.mxu1 %v1797_v26  ;;  %v1796_v30 = vld [vmem:[#allocation9 + $0x30] sm:$0xff] }
 0x2a3   : > { %v1456_v31 = vmax.f32 %v1452_v29, 0.0  ;;  %v1388_v51 = vpop.f32.mrf.mxu2  ;;  %1819 = vmatpush.msrb.mxu1 %v1796_v30 }
 0x2a5   : > { %v1465_v33 = vrot.slane %v1456_v31, 6 }
 0x2a6   : > { %v1437_v35 = vpop.f32.mrf.mxu3 }
 0x2a7   : > { %v1445_v36 = vadd.f32 %v1437_v35, %v1386_v34  ;;  %v3220_v37 = vsel %vm1463_vm5, %v1464_v23, %v1465_v33  ;;  %v1476_v49 = vsel %vm1463_vm5, %v1465_v33, 0.0  ;;  %v1777_v34 = vld [vmem:[#allocation9 + $0x10] sm:$0xff]  ;;  %v1795_v35 = vld [vmem:[#allocation9 + $0x28] sm:$0xff] }
 0x2a8   : > { %2429 = vmatmul.msk.f32.gmra.mxu1 %vm950_vm4, %v3220_v37  ;;  %v1487_v40 = vrot.slane %v3220_v37, 1  ;;  %v1576_v41 = vrot.slane %v3220_v37, 2  ;;  %v1633_v43 = vrot.slane %v3220_v37, 3  ;;  %v1351_v45 = vpop.f32.mrf.mxu1  ;;  %v1489_v55 = vrot.slane %v1476_v49, 1  ;;  %1856 = vmatpush.msrb.mxu2 %v1777_v34 }
 0x2a9   : > { %v1453_v44 = vadd.f32 %v2579_v14, %v1445_v36  ;;  %v1389_v53 = vadd.f32 %v1388_v51, %v1351_v45  ;;  %v1578_v56 = vrot.slane %v1476_v49, 2  ;;  %v1635_v59 = vrot.slane %v1476_v49, 3  ;;  %v1776_v36 = vld [vmem:[#allocation9 + $0x8] sm:$0xff]  ;;  %1820 = vmatpush.msrb.mxu1 %v1795_v35  ;;  %v1941_v45 = vld [vmem:[#allocation9 + $0x70] sm:$0xff] }
 0x2aa   : > { %v1488_v46 = vsel %vm755_vm1, %v1486_v38, %v1487_v40  ;;  %v1577_v47 = vsel %vm843_vm3, %v1575_v39, %v1576_v41  ;;  %v1634_v48 = vsel %vm1631_vm6, %v1632_v42, %v1633_v43  ;;  %v1490_v61 = vsel %vm755_vm1, %v1487_v40, %v1489_v55  ;;  %1857 = vmatpush.msrb.mxu2 %v1776_v36  ;;  %v1886_v40 = vld [vmem:[#allocation9 + $0x58] sm:$0xff] }
 0x2ab   : > { %v1457_v50 = vmax.f32 %v1453_v44, 0.0  ;;  %2424 = vmatmul.msk.f32.vlgmr.msrb.gmra.mxu0 %vm950_vm4, %v1488_v46  ;;  %2436 = vmatmul.msk.f32.vlgmr.msra.gmra.mxu2 %vm950_vm4, %v1577_v47  ;;  %v1579_v62 = vsel %vm843_vm3, %v1576_v41, %v1578_v56  ;;  %v1636_v0 = vsel %vm1631_vm6, %v1633_v43, %v1635_v59  ;;  %v1690_v19 = vrot.slane %v3220_v37, 4  ;;  %v1775_v37 = vld [vmem:[#allocation9] sm:$0xff]  ;;  %v1942_v42 = vld [vmem:[#allocation9 + $0x78] sm:$0xff]  ;;  %v1885_v44 = vld [vmem:[#allocation9 + $0x50] sm:$0xff] }
 0x2ac   : > { %2444 = vmatmul.msk.f32.vlgmr.msra.gmra.mxu3 %vm950_vm4, %v1634_v48  ;;  %v1692_v22 = vrot.slane %v1476_v49, 4  ;;  %1858 = vmatpush.msrb.mxu2 %v1775_v37  ;;  %v1794_v41 = vld [vmem:[#allocation9 + $0x20] sm:$0xff]  ;;  %v1884_v46 = vld [vmem:[#allocation9 + $0x48] sm:$0xff] }
 0x2ad   : > { %v1467_v52 = vrot.slane %v1457_v50, 6  ;;  %v1691_v21 = vsel %vm1688_vm7, %v1689_v20, %v1690_v19  ;;  %1907 = vmatpush.msrb.mxu3 %v1886_v40  ;;  %1821 = vmatpush.msrb.mxu1 %v1794_v41  ;;  %v1940_v47 = vld [vmem:[#allocation9 + $0x68] sm:$0xff]  ;;  %v1883_v48 = vld [vmem:[#allocation9 + $0x40] sm:$0xff] }
 0x2ae   : > { %v1440_v54 = vpop.f32.mrf.mxu3  ;;  %v1693_v23 = vsel %vm1688_vm7, %v1690_v19, %v1692_v22  ;;  %1963 = vmatpush.msrb.mxu0 %v1942_v42  ;;  %v1939_v49 = vld [vmem:[#allocation9 + $0x60] sm:$0xff] }
 0x2af   : > { %v1475_v57 = vsel %vm1463_vm5, 0.0, %v1467_v52  ;;  %v1446_v58 = vadd.f32 %v1440_v54, %v1389_v53  ;;  %1908 = vmatpush.msrb.mxu3 %v1885_v44  ;;  %v1998_v53 = vld [vmem:[#allocation9 + $0x98] sm:$0xff] }
 0x2b0   : > { %2430 = vmatmul.msk.f32.gmra.mxu1 %vm950_vm4, %v1475_v57  ;;  %v1491_v3 = vrot.slane %v1475_v57, 1  ;;  %v1580_v4 = vrot.slane %v1475_v57, 2  ;;  %v1637_v7 = vrot.slane %v1475_v57, 3  ;;  %v1694_v25 = vrot.slane %v1475_v57, 4  ;;  %1964 = vmatpush.msrb.mxu0 %v1941_v45 }
 0x2b1   : > { %v1454_v60 = vadd.f32 %v2579_v14, %v1446_v58  ;;  %1909 = vmatpush.msrb.mxu3 %v1884_v46  ;;  %2019 = vmatpush.msra.mxu1 %v1998_v53  ;;  %v2580_v58 = vld [vmem:[%s3399_s10] ss:$0 sm:$0xff] }
 0x2b2   : > { %1965 = vmatpush.msrb.mxu0 %v1940_v47 }
 0x2b3   : > { %v1458_v63 = vmax.f32 %v1454_v60, 0.0  ;;  %2425 = vmatmul.msk.f32.gmra.mxu0 %vm950_vm4, %v1490_v61  ;;  %2437 = vmatmul.msk.f32.gmra.mxu2 %vm950_vm4, %v1579_v62  ;;  %v1997_v62 = vld [vmem:[#allocation9 + $0x90] sm:$0xff] }
 0x2b4   : > { %2445 = vmatmul.msk.f32.gmra.mxu3 %vm950_vm4, %v1636_v0  ;;  %1966 = vmatpush.msrb.mxu0 %v1939_v49 }
 0x2b5   : > { %v1468_v1 = vrot.slane %v1458_v63, 6  ;;  %1910 = vmatpush.msrb.mxu3 %v1883_v48  ;;  %2020 = vmatpush.msra.mxu1 %v1997_v62 }
 0x2b7   : > { %v1469_v2 = vsel %vm1463_vm5, %v1467_v52, %v1468_v1  ;;  %v1477_v12 = vsel %vm1463_vm5, %v1468_v1, 0.0 }
 0x2b8   : > { %2431 = vmatmul.msk.f32.gmra.mxu1 %vm950_vm4, %v1469_v2  ;;  %v1492_v5 = vrot.slane %v1469_v2, 1  ;;  %v1581_v6 = vrot.slane %v1469_v2, 2  ;;  %v1638_v8 = vrot.slane %v1469_v2, 3  ;;  %v1494_v13 = vrot.slane %v1477_v12, 1 }
 0x2b9   : > { %v1583_v14 = vrot.slane %v1477_v12, 2  ;;  %v1640_v15 = vrot.slane %v1477_v12, 3  ;;  %v1695_v24 = vrot.slane %v1469_v2, 4  ;;  %v1697_v28 = vrot.slane %v1477_v12, 4 }
 0x2ba   : > { %v1493_v9 = vsel %vm755_vm1, %v1491_v3, %v1492_v5  ;;  %v1582_v10 = vsel %vm843_vm3, %v1580_v4, %v1581_v6  ;;  %v1639_v11 = vsel %vm1631_vm6, %v1637_v7, %v1638_v8  ;;  %v1495_v16 = vsel %vm755_vm1, %v1492_v5, %v1494_v13  ;;  %v1996_v5 = vld [vmem:[#allocation9 + $0x88] sm:$0xff] }
 0x2bb   : > { %2426 = vmatmul.msk.f32.gmra.mxu0 %vm950_vm4, %v1493_v9  ;;  %2438 = vmatmul.msk.f32.gmra.mxu2 %vm950_vm4, %v1582_v10  ;;  %v1584_v17 = vsel %vm843_vm3, %v1581_v6, %v1583_v14  ;;  %v1641_v18 = vsel %vm1631_vm6, %v1638_v8, %v1640_v15  ;;  %v1696_v27 = vsel %vm1688_vm7, %v1694_v25, %v1695_v24 }
 0x2bc   : > { %2446 = vmatmul.msk.f32.gmra.mxu3 %vm950_vm4, %v1639_v11  ;;  %v1698_v29 = vsel %vm1688_vm7, %v1695_v24, %v1697_v28  ;;  %2021 = vmatpush.msra.mxu1 %v1996_v5 }
 0x2c3   : > { %2427 = vmatmul.msk.f32.gmra.mxu0 %vm950_vm4, %v1495_v16  ;;  %2439 = vmatmul.msk.f32.gmra.mxu2 %vm950_vm4, %v1584_v17  ;;  %v1995_v16 = vld [vmem:[#allocation9 + $0x80] sm:$0xff] }
 0x2c4   : > { %2447 = vmatmul.msk.f32.gmra.mxu3 %vm950_vm4, %v1641_v18  ;;  %2022 = vmatpush.msra.mxu1 %v1995_v16 }
 0x2cb   : > { %2452 = vmatmul.msk.f32.vlgmr.msra.gmra.mxu0 %vm950_vm4, %v1691_v21 }
 0x2d3   : > { %2453 = vmatmul.msk.f32.gmra.mxu0 %vm950_vm4, %v1693_v23 }
 0x2db   : > { %2454 = vmatmul.msk.f32.gmra.mxu0 %vm950_vm4, %v1696_v27 }
 0x2e3   : > { %2455 = vmatmul.msk.f32.gmra.mxu0 %vm950_vm4, %v1698_v29 }
 0x31d   : > { %v1563_v39 = vpop.f32.mrf.mxu1 }
 0x325   : > { %v1566_v54 = vpop.f32.mrf.mxu1 }
 0x328   : > { %v1526_v31 = vpop.f32.mrf.mxu0 }
 0x329   : > { %v1564_v52 = vadd.f32 %v1563_v39, %v1526_v31 }
 0x32d   : > { %v1569_v2 = vpop.f32.mrf.mxu1 }
 0x32e   : > { %v1615_v43 = vpop.f32.mrf.mxu2 }
 0x32f   : > { %v1672_v50 = vpop.f32.mrf.mxu3  ;;  %v1627_v55 = vadd.f32 %v1615_v43, %v1564_v52 }
 0x330   : > { %v1529_v33 = vpop.f32.mrf.mxu0 }
 0x331   : > { %v1684_v57 = vadd.f32 %v1672_v50, %v1627_v55  ;;  %v1567_v60 = vadd.f32 %v1566_v54, %v1529_v33 }
 0x335   : > { %v1572_v17 = vpop.f32.mrf.mxu1 }
 0x336   : > { %v1618_v56 = vpop.f32.mrf.mxu2 }
 0x337   : > { %v1675_v63 = vpop.f32.mrf.mxu3  ;;  %v1628_v0 = vadd.f32 %v1618_v56, %v1567_v60 }
 0x338   : > { %v1532_v38 = vpop.f32.mrf.mxu0 }
 0x339   : > { %v1685_v6 = vadd.f32 %v1675_v63, %v1628_v0  ;;  %v1570_v9 = vadd.f32 %v1569_v2, %v1532_v38 }
 0x33e   : > { %v1621_v4 = vpop.f32.mrf.mxu2 }
 0x33f   : > { %v1629_v12 = vadd.f32 %v1621_v4, %v1570_v9  ;;  %v1678_v14 = vpop.f32.mrf.mxu3 }
 0x340   : > { %v1535_v51 = vpop.f32.mrf.mxu0 }
 0x341   : > { %v1686_v18 = vadd.f32 %v1678_v14, %v1629_v12  ;;  %v1573_v20 = vadd.f32 %v1572_v17, %v1535_v51  ;;  %v2054_v17 = vld [vmem:[#allocation10 + $0x10] sm:$0xff] }
 0x346   : > { %v1624_v21 = vpop.f32.mrf.mxu2 }
 0x347   : > { %v1630_v31 = vadd.f32 %v1624_v21, %v1573_v20  ;;  %v1681_v38 = vpop.f32.mrf.mxu3 }
 0x348   : > { %v1729_v59 = vpop.f32.mrf.mxu0 }
 0x349   : > { %v1741_v61 = vadd.f32 %v1729_v59, %v1684_v57  ;;  %v1687_v39 = vadd.f32 %v1681_v38, %v1630_v31  ;;  %v2110_v38 = vld [vmem:[#allocation12 + $0x28] sm:$0xff] }
 0x34b   : > { %v1749_v1 = vadd.f32 %v2580_v58, %v1741_v61 }
 0x34d   : > { %v1753_v3 = vmax.f32 %v1749_v1, 0.0 }
 0x34f   : > { %v1761_v7 = vrot.slane %v1753_v3, 6 }
 0x350   : > { %v1732_v8 = vpop.f32.mrf.mxu0 }
 0x351   : > { %v3274_v10 = vsel %vm1463_vm5, 0.0, %v1761_v7  ;;  %v1742_v11 = vadd.f32 %v1732_v8, %v1685_v6 }
 0x352   : > { %2460 = vmatmul.msk.f32.vlgmr.msrb.gmra.mxu2 %vm950_vm4, %v3274_v10  ;;  %v1783_v25 = vrot.slane %v3274_v10, 1  ;;  %v1872_v27 = vrot.slane %v3274_v10, 2  ;;  %v1928_v26 = vrot.slane %v3274_v10, 3 }
 0x353   : > { %v1750_v13 = vadd.f32 %v2580_v58, %v1742_v11 }
 0x355   : > { %v1754_v15 = vmax.f32 %v1750_v13, 0.0 }
 0x357   : > { %v1762_v19 = vrot.slane %v1754_v15, 6 }
 0x358   : > { %v1735_v22 = vpop.f32.mrf.mxu0 }
 0x359   : > { %v1743_v23 = vadd.f32 %v1735_v22, %v1686_v18  ;;  %v3279_v24 = vsel %vm1463_vm5, %v1761_v7, %v1762_v19  ;;  %v1773_v36 = vsel %vm1463_vm5, %v1762_v19, 0.0  ;;  %v1984_v7 = vrot.slane %v3274_v10, 4  ;;  %v2055_v10 = vld [vmem:[#allocation10 + $0x18] sm:$0xff]  ;;  %v2053_v18 = vld [vmem:[#allocation10 + $0x8] sm:$0xff]  ;;  %v2052_v19 = vld [vmem:[#allocation10] sm:$0xff] }
 0x35a   : > { %2461 = vmatmul.msk.f32.gmra.mxu2 %vm950_vm4, %v3279_v24  ;;  %v1784_v28 = vrot.slane %v3279_v24, 1  ;;  %v1873_v29 = vrot.slane %v3279_v24, 2  ;;  %v1929_v30 = vrot.slane %v3279_v24, 3  ;;  %v1786_v42 = vrot.slane %v1773_v36, 1 }
 0x35b   : > { %v1751_v32 = vadd.f32 %v2580_v58, %v1743_v23  ;;  %v1875_v43 = vrot.slane %v1773_v36, 2  ;;  %v1931_v46 = vrot.slane %v1773_v36, 3  ;;  %v1985_v6 = vrot.slane %v3279_v24, 4  ;;  %2084 = vmatpush.msra.mxu2 %v2055_v10 }
 0x35c   : > { %v1785_v33 = vsel %vm755_vm1, %v1783_v25, %v1784_v28  ;;  %v1874_v34 = vsel %vm843_vm3, %v1872_v27, %v1873_v29  ;;  %v1930_v35 = vsel %vm1631_vm6, %v1928_v26, %v1929_v30  ;;  %v1787_v48 = vsel %vm755_vm1, %v1784_v28, %v1786_v42  ;;  %v2109_v42 = vld [vmem:[#allocation12 + $0x20] sm:$0xff] }
 0x35d   : > { %v1755_v37 = vmax.f32 %v1751_v32, 0.0  ;;  %2456 = vmatmul.msk.f32.vlgmr.msrb.gmra.mxu1 %vm950_vm4, %v1785_v33  ;;  %2464 = vmatmul.msk.f32.vlgmr.msrb.gmra.mxu3 %vm950_vm4, %v1874_v34  ;;  %v1876_v49 = vsel %vm843_vm3, %v1873_v29, %v1875_v43  ;;  %v1932_v51 = vsel %vm1631_vm6, %v1929_v30, %v1931_v46  ;;  %v1986_v8 = vsel %vm1688_vm7, %v1984_v7, %v1985_v6  ;;  %v2581_v32 = vld [vmem:[%s3401_s12] ss:$0 sm:$0xff]  ;;  %v2112_v33 = vld [vmem:[#allocation12 + $0x38] sm:$0xff]  ;;  %v2111_v34 = vld [vmem:[#allocation12 + $0x30] sm:$0xff] }
 0x35e   : > { %2468 = vmatmul.msk.f32.vlgmr.msrb.gmra.mxu0 %vm950_vm4, %v1930_v35  ;;  %v1987_v9 = vrot.slane %v1773_v36, 4  ;;  %2085 = vmatpush.msra.mxu2 %v2054_v17  ;;  %v2166_v17 = vld [vmem:[%s3406_s17 + $0x18] sm:$0xff] }
 0x35f   : > { %v1764_v40 = vrot.slane %v1755_v37, 6  ;;  %2138 = vmatpush.msra.mxu3 %v2112_v33 }
 0x360   : > { %v1738_v41 = vpop.f32.mrf.mxu0  ;;  %v1988_v11 = vsel %vm1688_vm7, %v1985_v6, %v1987_v9  ;;  %2086 = vmatpush.msra.mxu2 %v2053_v18  ;;  %v2582_v9 = vld [vmem:[%s3403_s14] ss:$0 sm:$0xff]  ;;  %v2165_v18 = vld [vmem:[%s3406_s17 + $0x10] sm:$0xff] }
 0x361   : > { %v1772_v44 = vsel %vm1463_vm5, 0.0, %v1764_v40  ;;  %v1744_v45 = vadd.f32 %v1738_v41, %v1687_v39  ;;  %2139 = vmatpush.msra.mxu3 %v2111_v34 }
 0x362   : > { %2462 = vmatmul.msk.f32.gmra.mxu2 %vm950_vm4, %v1772_v44  ;;  %v1788_v54 = vrot.slane %v1772_v44, 1  ;;  %v1877_v55 = vrot.slane %v1772_v44, 2  ;;  %v1989_v13 = vrot.slane %v1772_v44, 4 }
 0x363   : > { %v1752_v47 = vadd.f32 %v2580_v58, %v1744_v45  ;;  %v1933_v58 = vrot.slane %v1772_v44, 3  ;;  %2087 = vmatpush.msra.mxu2 %v2052_v19  ;;  %2140 = vmatpush.msra.mxu3 %v2110_v38  ;;  %v2108_v45 = vld [vmem:[#allocation12 + $0x18] sm:$0xff]  ;;  %v2164_v19 = vld [vmem:[%s3406_s17 + $0x8] sm:$0xff] }
 0x365   : > { %v1756_v50 = vmax.f32 %v1752_v47, 0.0  ;;  %2457 = vmatmul.msk.f32.gmra.mxu1 %vm950_vm4, %v1787_v48  ;;  %2465 = vmatmul.msk.f32.gmra.mxu3 %vm950_vm4, %v1876_v49  ;;  %v2107_v48 = vld [vmem:[#allocation12 + $0x10] sm:$0xff] }
 0x366   : > { %2469 = vmatmul.msk.f32.gmra.mxu0 %vm950_vm4, %v1932_v51  ;;  %2141 = vmatpush.msra.mxu3 %v2109_v42 }
 0x367   : > { %v1765_v52 = vrot.slane %v1756_v50, 6 }
 0x368   : > { %2142 = vmatpush.msra.mxu3 %v2108_v45 }
 0x369   : > { %v1766_v53 = vsel %vm1463_vm5, %v1764_v40, %v1765_v52  ;;  %v1774_v63 = vsel %vm1463_vm5, %v1765_v52, 0.0  ;;  %v2106_v52 = vld [vmem:[#allocation12 + $0x8] sm:$0xff] }
 0x36a   : > { %2463 = vmatmul.msk.f32.gmra.mxu2 %vm950_vm4, %v1766_v53  ;;  %v1789_v56 = vrot.slane %v1766_v53, 1  ;;  %v1878_v57 = vrot.slane %v1766_v53, 2  ;;  %v1934_v59 = vrot.slane %v1766_v53, 3  ;;  %v1791_v0 = vrot.slane %v1774_v63, 1  ;;  %2143 = vmatpush.msra.mxu3 %v2107_v48 }
 0x36b   : > { %v1880_v1 = vrot.slane %v1774_v63, 2  ;;  %v1936_v2 = vrot.slane %v1774_v63, 3  ;;  %v1990_v12 = vrot.slane %v1766_v53, 4  ;;  %v1992_v15 = vrot.slane %v1774_v63, 4 }
 0x36c   : > { %v1790_v60 = vsel %vm755_vm1, %v1788_v54, %v1789_v56  ;;  %v1879_v61 = vsel %vm843_vm3, %v1877_v55, %v1878_v57  ;;  %v1935_v62 = vsel %vm1631_vm6, %v1933_v58, %v1934_v59  ;;  %v1792_v3 = vsel %vm755_vm1, %v1789_v56, %v1791_v0  ;;  %2144 = vmatpush.msra.mxu3 %v2106_v52 }
 0x36d   : > { %2458 = vmatmul.msk.f32.gmra.mxu1 %vm950_vm4, %v1790_v60  ;;  %2466 = vmatmul.msk.f32.gmra.mxu3 %vm950_vm4, %v1879_v61  ;;  %v1881_v4 = vsel %vm843_vm3, %v1878_v57, %v1880_v1  ;;  %v1937_v5 = vsel %vm1631_vm6, %v1934_v59, %v1936_v2  ;;  %v1991_v14 = vsel %vm1688_vm7, %v1989_v13, %v1990_v12  ;;  %v2168_v13 = vld [vmem:[%s3406_s17 + $0x28] sm:$0xff] }
 0x36e   : > { %2470 = vmatmul.msk.f32.gmra.mxu0 %vm950_vm4, %v1935_v62  ;;  %v1993_v16 = vsel %vm1688_vm7, %v1990_v12, %v1992_v15  ;;  %v2169_v12 = vld [vmem:[%s3406_s17 + $0x30] sm:$0xff] }
 0x375   : > { %2459 = vmatmul.msk.f32.gmra.mxu1 %vm950_vm4, %v1792_v3  ;;  %2467 = vmatmul.msk.f32.gmra.mxu3 %vm950_vm4, %v1881_v4 }
 0x376   : > { %2471 = vmatmul.msk.f32.gmra.mxu0 %vm950_vm4, %v1937_v5 }
 0x37d   : > { %2472 = vmatmul.msk.f32.vlgmr.msra.gmra.mxu1 %vm950_vm4, %v1986_v8  ;;  %v2105_v8 = vld [vmem:[#allocation12] sm:$0xff] }
 0x37e   : > { %2145 = vmatpush.msra.mxu3 %v2105_v8 }
 0x385   : > { %2473 = vmatmul.msk.f32.gmra.mxu1 %vm950_vm4, %v1988_v11  ;;  %v2170_v11 = vld [vmem:[%s3406_s17 + $0x38] sm:$0xff] }
 0x386   : > { %2195 = vmatpush.msra.mxu0 %v2170_v11 }
 0x388   : > { %2196 = vmatpush.msra.mxu0 %v2169_v12 }
 0x38a   : > { %2197 = vmatpush.msra.mxu0 %v2168_v13 }
 0x38d   : > { %2474 = vmatmul.msk.f32.gmra.mxu1 %vm950_vm4, %v1991_v14 }
 0x395   : > { %2475 = vmatmul.msk.f32.gmra.mxu1 %vm950_vm4, %v1993_v16  ;;  %v2167_v16 = vld [vmem:[%s3406_s17 + $0x20] sm:$0xff] }
 0x396   : > { %2198 = vmatpush.msra.mxu0 %v2167_v16 }
 0x398   : > { %2199 = vmatpush.msra.mxu0 %v2166_v17 }
 0x39a   : > { %2200 = vmatpush.msra.mxu0 %v2165_v18 }
 0x39c   : > { %2201 = vmatpush.msra.mxu0 %v2164_v19 }
 0x3d5   : > { %v1860_v23 = vpop.f32.mrf.mxu2 }
 0x3da   : > { %v1823_v20 = vpop.f32.mrf.mxu1 }
 0x3db   : > { %v1968_v25 = vpop.f32.mrf.mxu0  ;;  %v1861_v28 = vadd.f32 %v1860_v23, %v1823_v20 }
 0x3dd   : > { %v1863_v29 = vpop.f32.mrf.mxu2 }
 0x3e0   : > { %v1912_v24 = vpop.f32.mrf.mxu3 }
 0x3e1   : > { %v1924_v26 = vadd.f32 %v1912_v24, %v1861_v28 }
 0x3e2   : > { %v1826_v21 = vpop.f32.mrf.mxu1 }
 0x3e3   : > { %v1980_v31 = vadd.f32 %v1968_v25, %v1924_v26  ;;  %v1864_v36 = vadd.f32 %v1863_v29, %v1826_v21  ;;  %v1971_v39 = vpop.f32.mrf.mxu0  ;;  %v2163_v26 = vld [vmem:[%s3406_s17] sm:$0xff] }
 0x3e4   : > { %2202 = vmatpush.msra.mxu0 %v2163_v26 }
 0x3e5   : > { %v1866_v43 = vpop.f32.mrf.mxu2 }
 0x3e8   : > { %v1915_v30 = vpop.f32.mrf.mxu3 }
 0x3e9   : > { %v1925_v40 = vadd.f32 %v1915_v30, %v1864_v36  ;;  %v2583_v30 = vld [vmem:[%s3405_s16] ss:$0 sm:$0xff] }
 0x3ea   : > { %v1829_v22 = vpop.f32.mrf.mxu1 }
 0x3eb   : > { %v1981_v47 = vadd.f32 %v1971_v39, %v1925_v40  ;;  %v1867_v50 = vadd.f32 %v1866_v43, %v1829_v22  ;;  %v1974_v55 = vpop.f32.mrf.mxu0  ;;  %v2584_v43 = vld [vmem:[%s3407_s18] ss:$0 sm:$0xff] }
 0x3ed   : > { %v1869_v57 = vpop.f32.mrf.mxu2 }
 0x3f0   : > { %v1918_v46 = vpop.f32.mrf.mxu3 }
 0x3f1   : > { %v1926_v53 = vadd.f32 %v1918_v46, %v1867_v50 }
 0x3f2   : > { %v1832_v27 = vpop.f32.mrf.mxu1 }
 0x3f3   : > { %v1982_v58 = vadd.f32 %v1974_v55, %v1926_v53  ;;  %v1870_v61 = vadd.f32 %v1869_v57, %v1832_v27  ;;  %v1977_v2 = vpop.f32.mrf.mxu0 }
 0x3f8   : > { %v1921_v59 = vpop.f32.mrf.mxu3 }
 0x3f9   : > { %v1927_v63 = vadd.f32 %v1921_v59, %v1870_v61 }
 0x3fa   : > { %v2024_v35 = vpop.f32.mrf.mxu1 }
 0x3fb   : > { %v2036_v37 = vadd.f32 %v2024_v35, %v1980_v31  ;;  %v1983_v3 = vadd.f32 %v1977_v2, %v1927_v63 }
 0x3fd   : > { %v2044_v41 = vadd.f32 %v2581_v32, %v2036_v37 }
 0x3ff   : > { %v2048_v44 = vmax.f32 %v2044_v41, 0.0 }
 0x401   : > { %2476 = vmatmul.msk.f32.vlgmr.msra.gmra.mxu2 %vm950_vm4, %v2048_v44 }
 0x402   : > { %v2027_v49 = vpop.f32.mrf.mxu1 }
 0x403   : > { %v2037_v51 = vadd.f32 %v2027_v49, %v1981_v47 }
 0x405   : > { %v2045_v54 = vadd.f32 %v2581_v32, %v2037_v51 }
 0x407   : > { %v2049_v56 = vmax.f32 %v2045_v54, 0.0 }
 0x409   : > { %2477 = vmatmul.msk.f32.gmra.mxu2 %vm950_vm4, %v2049_v56 }
 0x40a   : > { %v2030_v60 = vpop.f32.mrf.mxu1 }
 0x40b   : > { %v2038_v62 = vadd.f32 %v2030_v60, %v1982_v58 }
 0x40d   : > { %v2046_v0 = vadd.f32 %v2581_v32, %v2038_v62 }
 0x40f   : > { %v2050_v1 = vmax.f32 %v2046_v0, 0.0 }
 0x411   : > { %2478 = vmatmul.msk.f32.gmra.mxu2 %vm950_vm4, %v2050_v1 }
 0x412   : > { %v2033_v4 = vpop.f32.mrf.mxu1 }
 0x413   : > { %v2039_v5 = vadd.f32 %v2033_v4, %v1983_v3 }
 0x415   : > { %v2047_v6 = vadd.f32 %v2581_v32, %v2039_v5 }
 0x417   : > { %v2051_v7 = vmax.f32 %v2047_v6, 0.0 }
 0x419   : > { %2479 = vmatmul.msk.f32.gmra.mxu2 %vm950_vm4, %v2051_v7 }
 0x484   : > { %v2089_v14 = vpop.f32.mrf.mxu2 }
 0x485   : > { %v2090_v15 = vadd.f32 %v2582_v9, %v2089_v14 }
 0x487   : > { %v2101_v10 = vmax.f32 %v2090_v15, 0.0 }
 0x489   : > { %2480 = vmatmul.msk.f32.vlgmr.msra.gmra.mxu3 %vm2117_vm8, %v2101_v10 }
 0x48c   : > { %v2092_v20 = vpop.f32.mrf.mxu2 }
 0x48d   : > { %v2093_v21 = vadd.f32 %v2582_v9, %v2092_v20 }
 0x48f   : > { %v2102_v22 = vmax.f32 %v2093_v21, 0.0 }
 0x491   : > { %2481 = vmatmul.msk.f32.gmra.mxu3 %vm2117_vm8, %v2102_v22 }
 0x494   : > { %v2095_v23 = vpop.f32.mrf.mxu2 }
 0x495   : > { %v2096_v24 = vadd.f32 %v2582_v9, %v2095_v23 }
 0x497   : > { %v2103_v25 = vmax.f32 %v2096_v24, 0.0 }
 0x499   : > { %2482 = vmatmul.msk.f32.gmra.mxu3 %vm2117_vm8, %v2103_v25 }
 0x49c   : > { %v2098_v27 = vpop.f32.mrf.mxu2 }
 0x49d   : > { %v2099_v28 = vadd.f32 %v2582_v9, %v2098_v27 }
 0x49f   : > { %v2104_v29 = vmax.f32 %v2099_v28, 0.0 }
 0x4a1   : > { %2483 = vmatmul.msk.f32.gmra.mxu3 %vm2117_vm8, %v2104_v29 }
 0x50c   : > { %v2147_v31 = vpop.f32.mrf.mxu3 }
 0x50d   : > { %v2148_v32 = vadd.f32 %v2583_v30, %v2147_v31 }
 0x50f   : > { %v2159_v33 = vmax.f32 %v2148_v32, 0.0 }
 0x511   : > { %2484 = vmatmul.msk.f32.vlgmr.msra.gmra.mxu0 %vm2117_vm8, %v2159_v33 }
 0x514   : > { %v2150_v34 = vpop.f32.mrf.mxu3 }
 0x515   : > { %v2151_v35 = vadd.f32 %v2583_v30, %v2150_v34 }
 0x517   : > { %v2160_v36 = vmax.f32 %v2151_v35, 0.0 }
 0x519   : > { %2485 = vmatmul.msk.f32.gmra.mxu0 %vm2117_vm8, %v2160_v36 }
 0x51c   : > { %v2153_v37 = vpop.f32.mrf.mxu3 }
 0x51d   : > { %v2154_v38 = vadd.f32 %v2583_v30, %v2153_v37 }
 0x51f   : > { %v2161_v39 = vmax.f32 %v2154_v38, 0.0 }
 0x521   : > { %2486 = vmatmul.msk.f32.gmra.mxu0 %vm2117_vm8, %v2161_v39 }
 0x524   : > { %v2156_v40 = vpop.f32.mrf.mxu3 }
 0x525   : > { %v2157_v41 = vadd.f32 %v2583_v30, %v2156_v40 }
 0x527   : > { %v2162_v42 = vmax.f32 %v2157_v41, 0.0 }
 0x529   : > { %2487 = vmatmul.msk.f32.gmra.mxu0 %vm2117_vm8, %v2162_v42 }
 0x58e   : > { %v2204_v44 = vpop.f32.mrf.mxu0 }
 0x58f   : > { %v2205_v45 = vadd.f32 %v2584_v43, %v2204_v44 }
 0x591   : > { %2216 = vst.msk [vmem:[%s725_s24] sm:$0xff] %vm768_vm2, %v2205_v45 }
 0x596   : > { %v2207_v46 = vpop.f32.mrf.mxu0 }
 0x597   : > { %v2208_v47 = vadd.f32 %v2584_v43, %v2207_v46 }
 0x599   : > { %2217 = vst.msk [vmem:[%s725_s24 + $0x8] sm:$0xff] %vm768_vm2, %v2208_v47 }
 0x59e   : > { %v2210_v48 = vpop.f32.mrf.mxu0 }
 0x59f   : > { %v2211_v49 = vadd.f32 %v2584_v43, %v2210_v48 }
 0x5a1   : > { %2218 = vst.msk [vmem:[%s725_s24 + $0x10] sm:$0xff] %vm768_vm2, %v2211_v49 }
 0x5a6   : > { %v2213_v50 = vpop.f32.mrf.mxu0 }
 0x5a7   : > { %v2214_v51 = vadd.f32 %v2584_v43, %v2213_v50 }
 0x5a9   : > { %2219 = vst.msk [vmem:[%s725_s24 + $0x18] sm:$0xff] %vm768_vm2, %v2214_v51 }
 0x5aa PF: > { %s33_s0 = sadd.s32 1, %s2817_s0  }
 0x5ab   : > { %p30_p7 = scmp.ge.s32.totalorder %s33_s0, 4  }
 0x5ad   :  { %32 = sbr.rel (!%p30_p7) target bundleno = 12 (0xc), region = 171 }
 0x5b2   :  { %2244 = vsyncpa [#allocation3], 1 }
 0x5b3   :  { %2246 = vsyncpa [#allocation3 + $0x1], 1 }
 0x5b4   :  { %2247 = vsyncpa [#allocation5], 1 }
 0x5b5   :  { %2248 = vsyncpa [#allocation8], 1 }
 0x5b6   :  { %2249 = vsyncpa [#allocation11], 1 }

</bundles_post_ra>
